<compile_context>
chip_gen: v7x
topology: tpu7x:2x2x1
jax: 0.10.0
libtpu: 0.0.40
codegen_flags: <defaults>
</compile_context>

<pallas_src>
import functools

import numpy as np

import jax
import jax.numpy as jnp
from jax.experimental import pallas as pl
from jax.experimental.pallas import tpu as pltpu


def _round_up(x, m):
    return (x + m - 1) // m * m


# --------------------------------------------------------------------------
# host-side geometry: interior mask + parity masks for nearest-2x upsample
# --------------------------------------------------------------------------

def _make_masks(h, w, l_pad):
    """(5, l_pad) f32: [interior, odd/odd, odd/even, even/odd, even/even]."""
    wp = w + 2
    mk = np.zeros((5, l_pad), np.float32)
    for y in range(1, h + 1):          # padded coords of true pixels
        for x in range(1, w + 1):
            q = y * wp + x
            mk[0, q] = 1.0
            if y % 2 and x % 2:
                mk[1, q] = 1.0
            elif y % 2 and not x % 2:
                mk[2, q] = 1.0
            elif not y % 2 and x % 2:
                mk[3, q] = 1.0
            else:
                mk[4, q] = 1.0
    return jnp.asarray(mk)


# --------------------------------------------------------------------------
# the fused kernel (one grid step == one image)
# --------------------------------------------------------------------------

def _unet_kernel(x_ref, we_ref, be_ref, wb_ref, bb_ref, wd_ref, bd_ref,
                 wo_ref, bo_ref, mk_ref, o_ref,
                 cat_scr, wmax_scr, bt_scr, col_scr,
                 *, wp, l_pad, ext_f, ext_w):
    f32 = jnp.float32
    c_x = x_ref.shape[1]          # encoder input channels (padded to 8)
    c_e = be_ref.shape[0]         # encoder output channels (skip path)
    c_b = bb_ref.shape[0]         # bottleneck channels (up path)

    mask = mk_ref[0:1, :]         # 1 at true interior pixels
    m_oo = mk_ref[1:2, :]         # interior & (odd row, odd col)
    m_oe = mk_ref[2:3, :]
    m_eo = mk_ref[3:4, :]
    m_ee = mk_ref[4:5, :]

    # Zero only the flank columns; the interiors are fully overwritten below.
    for scr, ext in ((cat_scr, ext_f), (wmax_scr, ext_w), (bt_scr, ext_f)):
        scr[:, :ext] = jnp.zeros((scr.shape[0], ext), f32)
        scr[:, ext + l_pad:] = jnp.zeros(
            (scr.shape[0], scr.shape[1] - ext - l_pad), f32)

    def conv3x3(src, cin, ext, dil, w_ref, b_ref):
        """3x3 conv (optionally dilated) as ONE stacked-K GEMM via in-VMEM im2col."""
        taps = [(ky, kx) for ky in range(3) for kx in range(3)]
        for t, (ky, kx) in enumerate(taps):
            off = ext + dil * ((ky - 1) * wp + (kx - 1))
            col_scr[t * cin:(t + 1) * cin, :] = src[:, off:off + l_pad]
        stack = col_scr[0:9 * cin, :].astype(jnp.bfloat16)
        acc = jnp.dot(w_ref[...], stack, preferred_element_type=f32)
        return jnp.maximum(acc + b_ref[...], 0.0)

    # ---- encoder: conv3x3 + ReLU, zeroed on pad ring / dead lanes ----------
    e1 = conv3x3(x_ref[0], c_x, ext_f, 1, we_ref, be_ref) * mask
    cat_scr[c_b:c_b + c_e, ext_f:ext_f + l_pad] = e1            # skip path

    # ---- MaxPool2d(2): window max at every top-left (3 element-wise maxes) --
    ev = cat_scr[c_b:c_b + c_e, :]
    wm = jnp.maximum(
        jnp.maximum(ev[:, ext_f:ext_f + l_pad],
                    ev[:, ext_f + 1:ext_f + 1 + l_pad]),
        jnp.maximum(ev[:, ext_f + wp:ext_f + wp + l_pad],
                    ev[:, ext_f + wp + 1:ext_f + wp + 1 + l_pad]))
    # e1 == 0 on its pad ring, so wm is automatically zero wherever the pooled
    # grid's zero pad ring would be — no one-hot S matrix needed.
    wmax_scr[:, ext_w:ext_w + l_pad] = wm

    # ---- bottleneck: conv3x3 on the pooled grid == dilation-2 conv here -----
    # Only (odd, odd) positions are real pooled outputs; only those are read
    # by the parity-masked upsample below.
    bt = conv3x3(wmax_scr[...], c_e, ext_w, 2, wb_ref, bb_ref)
    bt_scr[:, ext_f:ext_f + l_pad] = bt

    # ---- nearest-2x upsample: parity-masked select of 4 shifted reads -------
    bv = bt_scr[...]
    up = (m_oo * bv[:, ext_f:ext_f + l_pad]
          + m_oe * bv[:, ext_f - 1:ext_f - 1 + l_pad]
          + m_eo * bv[:, ext_f - wp:ext_f - wp + l_pad]
          + m_ee * bv[:, ext_f - wp - 1:ext_f - wp - 1 + l_pad])
    cat_scr[0:c_b, ext_f:ext_f + l_pad] = up                    # up path

    # ---- decoder: ONE conv3x3 over concat([up, e1]) + ReLU ------------------
    dec = conv3x3(cat_scr[...], c_b + c_e, ext_f, 1, wd_ref, bd_ref)

    # ---- 1x1 conv (sublane reduce) + exact sigmoid epilogue -----------------
    y = jnp.sum(dec * wo_ref[...], axis=0, keepdims=True) + bo_ref[...]
    o_ref[0] = 1.0 / (1.0 + jnp.exp(-y))


# --------------------------------------------------------------------------
# parameters (synthetic weights in PyTorch OIHW layout)
# --------------------------------------------------------------------------

def init_params(key):
    ks = jax.random.split(key, 8)
    return {
        "enc_w": 0.1 * jax.random.normal(ks[0], (8, 4, 3, 3), jnp.float32),
        "enc_b": 0.1 * jax.random.normal(ks[1], (8,), jnp.float32),
        "bott_w": 0.1 * jax.random.normal(ks[2], (16, 8, 3, 3), jnp.float32),
        "bott_b": 0.1 * jax.random.normal(ks[3], (16,), jnp.float32),
        # decoder input channels: 0..15 = upsampled path, 16..23 = skip (e1)
        "dec_w": 0.1 * jax.random.normal(ks[4], (8, 24, 3, 3), jnp.float32),
        "dec_b": 0.1 * jax.random.normal(ks[5], (8,), jnp.float32),
        "out_w": 0.1 * jax.random.normal(ks[6], (1, 8, 1, 1), jnp.float32),
        "out_b": 0.1 * jax.random.normal(ks[7], (1,), jnp.float32),
    }


def _stack_conv_w(w_oihw, cin_pad=None):
    """(O, I, 3, 3) OIHW -> (O, 9*I) bf16 with column (ky*3+kx)*I + i."""
    o, i, kh, kw = w_oihw.shape
    if cin_pad is not None and cin_pad > i:
        w_oihw = jnp.pad(w_oihw, ((0, 0), (0, cin_pad - i), (0, 0), (0, 0)))
        i = cin_pad
    w = jnp.transpose(w_oihw, (0, 2, 3, 1)).reshape(o, kh * kw * i)
    return w.astype(jnp.bfloat16)


# --------------------------------------------------------------------------
# forward pass
# --------------------------------------------------------------------------

def unet_with_sigmoid(params, x_nchw):
    n, c_in, h, w = x_nchw.shape
    assert h % 2 == 0 and w % 2 == 0, "UNet needs even spatial dims"

    hp, wp = h + 2, w + 2
    l_img = hp * wp                       # per-image padded pixels (324)
    l_pad = _round_up(l_img, 128)         # lane-dense width (384)
    ext_f = wp + 1                        # flank for stride-1 taps
    ext_w = 2 * (wp + 1)                  # flank for dilation-2 taps

    c_e = params["enc_b"].shape[0]        # 8
    c_b = params["bott_b"].shape[0]       # 16
    c_x = max(8, _round_up(c_in, 8))      # sublane-aligned encoder input chans

    # glue: NCHW -> per-image zero-padded flat spatial on lanes, zero flanks
    xe = jnp.pad(x_nchw, ((0, 0), (0, c_x - c_in), (1, 1), (1, 1)))
    xe = xe.reshape(n, c_x, l_img)
    xe = jnp.pad(xe, ((0, 0), (0, 0), (ext_f, (l_pad - l_img) + ext_f)))

    enc_w = _stack_conv_w(params["enc_w"], cin_pad=c_x)          # (8, 72) bf16
    bott_w = _stack_conv_w(params["bott_w"])                     # (16, 72) bf16
    dec_w = _stack_conv_w(params["dec_w"])                       # (8, 216) bf16
    enc_b = params["enc_b"].reshape(-1, 1)
    bott_b = params["bott_b"].reshape(-1, 1)
    dec_b = params["dec_b"].reshape(-1, 1)
    out_w = params["out_w"].reshape(1, -1).T                     # (8, 1) f32
    out_b = params["out_b"].reshape(1, 1)
    masks = _make_masks(h, w, l_pad)

    inputs = (xe, enc_w, enc_b, bott_w, bott_b, dec_w, dec_b,
              out_w, out_b, masks)

    def full(a):
        nd = a.ndim
        return pl.BlockSpec(a.shape, lambda i, nd=nd: (0,) * nd)

    kernel = functools.partial(_unet_kernel, wp=wp, l_pad=l_pad,
                               ext_f=ext_f, ext_w=ext_w)

    flops = n * 2 * l_pad * (c_e * 9 * c_x + c_b * 9 * c_e
                             + c_e * 9 * (c_b + c_e) + c_e)
    bytes_acc = (sum(int(np.prod(a.shape)) * a.dtype.itemsize for a in inputs)
                 + n * l_pad * 4)

    y = pl.pallas_call(
        kernel,
        out_shape=jax.ShapeDtypeStruct((n, 1, l_pad), jnp.float32),
        grid_spec=pltpu.PrefetchScalarGridSpec(
            num_scalar_prefetch=0,
            grid=(n,),
            in_specs=[pl.BlockSpec((1, c_x, l_pad + 2 * ext_f),
                                   lambda i: (i, 0, 0))]
                     + [full(a) for a in inputs[1:]],
            out_specs=pl.BlockSpec((1, 1, l_pad), lambda i: (i, 0, 0)),
            scratch_shapes=[
                pltpu.VMEM((c_b + c_e, l_pad + 2 * ext_f), jnp.float32),  # [up;e1]
                pltpu.VMEM((c_e, l_pad + 2 * ext_w), jnp.float32),        # window max
                pltpu.VMEM((c_b, l_pad + 2 * ext_f), jnp.float32),        # bottleneck
                pltpu.VMEM((9 * (c_b + c_e), l_pad), jnp.float32),        # im2col stack
            ]),
        compiler_params=pltpu.CompilerParams(
            dimension_semantics=("parallel",)),
        cost_estimate=pl.CostEstimate(flops=flops,
                                      transcendentals=n * l_pad,
                                      bytes_accessed=bytes_acc),
    )(*inputs)

    # glue: flat padded layout -> NCHW interior
    y = y[:, :, :l_img].reshape(n, 1, hp, wp)
    return y[:, :, 1:h + 1, 1:w + 1]


# --------------------------------------------------------------------------
# pure-JAX reference of the synthesized base_model + sigmoid (for checking)
# --------------------------------------------------------------------------

def _reference_forward(params, x):
    def conv(v, w, b, pad):
        y = jax.lax.conv_general_dilated(
            v, w, (1, 1), [(pad, pad)] * 2,
            dimension_numbers=("NCHW", "OIHW", "NCHW"))
        return y + b.reshape(1, -1, 1, 1)

    e1 = jax.nn.relu(conv(x, params["enc_w"], params["enc_b"], 1))
    p = jax.lax.reduce_window(e1, -jnp.inf, jax.lax.max,
                              (1, 1, 2, 2), (1, 1, 2, 2), "VALID")
    bt = jax.nn.relu(conv(p, params["bott_w"], params["bott_b"], 1))
    up = jnp.repeat(jnp.repeat(bt, 2, axis=2), 2, axis=3)
    cat = jnp.concatenate([up, e1], axis=1)
    dec = jax.nn.relu(conv(cat, params["dec_w"], params["dec_b"], 1))
    out = conv(dec, params["out_w"], params["out_b"], 0)
    return jax.nn.sigmoid(out)


# --------------------------------------------------------------------------

if __name__ == "__main__":
    key = jax.random.PRNGKey(0)
    pkey, xkey = jax.random.split(key)
    params = init_params(pkey)

    x = jax.random.normal(xkey, (2, 4, 16, 16), jnp.float32)      # NCHW
    y = jax.jit(unet_with_sigmoid)(params, x)
    y = jax.block_until_ready(y)

    assert y.shape == (2, 1, 16, 16), y.shape
    assert bool(jnp.all(jnp.isfinite(y)))
    assert bool(jnp.all((y >= 0.0) & (y <= 1.0)))                 # sigmoid range

    ref = _reference_forward(params, x)
    err = float(jnp.max(jnp.abs(y - ref)))
    assert err < 2e-2, f"max abs err vs reference: {err}"

    print("KERNEL_OK")
</pallas_src>

<mosaic_0001>
module attributes {stable_mosaic.version = 11 : i64} {
  func.func @_unet_kernel(%arg0: i32, %arg1: memref<1x8x422xf32, #tpu.memory_space<vmem>>, %arg2: memref<8x72xbf16, #tpu.memory_space<vmem>>, %arg3: memref<8x1xf32, #tpu.memory_space<vmem>>, %arg4: memref<16x72xbf16, #tpu.memory_space<vmem>>, %arg5: memref<16x1xf32, #tpu.memory_space<vmem>>, %arg6: memref<8x216xbf16, #tpu.memory_space<vmem>>, %arg7: memref<8x1xf32, #tpu.memory_space<vmem>>, %arg8: memref<8x1xf32, #tpu.memory_space<vmem>>, %arg9: memref<1x1xf32, #tpu.memory_space<vmem>>, %arg10: memref<5x384xf32, #tpu.memory_space<vmem>>, %arg11: memref<1x1x384xf32, #tpu.memory_space<vmem>>, %arg12: memref<24x422xf32, #tpu.memory_space<vmem>>, %arg13: memref<8x460xf32, #tpu.memory_space<vmem>>, %arg14: memref<16x422xf32, #tpu.memory_space<vmem>>, %arg15: memref<216x384xf32, #tpu.memory_space<vmem>>) attributes {dimension_semantics = [#tpu.dimension_semantics<parallel>], iteration_bounds = array<i64: 2>, scalar_prefetch = 0 : i64, scratch_operands = 4 : i64, tpu.core_type = #tpu.core_type<tc>, window_params = [{transform_indices = @transform_0, window_bounds = array<i64: 1, 8, 422>}, {pipeline_mode = #tpu.pipeline_mode<synchronous>, transform_indices = @transform_1, window_bounds = array<i64: 8, 72>}, {pipeline_mode = #tpu.pipeline_mode<synchronous>, transform_indices = @transform_2, window_bounds = array<i64: 8, 1>}, {pipeline_mode = #tpu.pipeline_mode<synchronous>, transform_indices = @transform_3, window_bounds = array<i64: 16, 72>}, {pipeline_mode = #tpu.pipeline_mode<synchronous>, transform_indices = @transform_4, window_bounds = array<i64: 16, 1>}, {pipeline_mode = #tpu.pipeline_mode<synchronous>, transform_indices = @transform_5, window_bounds = array<i64: 8, 216>}, {pipeline_mode = #tpu.pipeline_mode<synchronous>, transform_indices = @transform_6, window_bounds = array<i64: 8, 1>}, {pipeline_mode = #tpu.pipeline_mode<synchronous>, transform_indices = @transform_7, window_bounds = array<i64: 8, 1>}, {pipeline_mode = #tpu.pipeline_mode<synchronous>, transform_indices = @transform_8, window_bounds = array<i64: 1, 1>}, {pipeline_mode = #tpu.pipeline_mode<synchronous>, transform_indices = @transform_9, window_bounds = array<i64: 5, 384>}, {transform_indices = @transform_10, window_bounds = array<i64: 1, 1, 384>}]} {
    %c0 = arith.constant 0 : index
    %c0_0 = arith.constant 0 : index
    %0 = vector.load %arg10[%c0, %c0_0] : memref<5x384xf32, #tpu.memory_space<vmem>>, vector<1x384xf32>
    %c1 = arith.constant 1 : index
    %c0_1 = arith.constant 0 : index
    %1 = vector.load %arg10[%c1, %c0_1] : memref<5x384xf32, #tpu.memory_space<vmem>>, vector<1x384xf32>
    %c2 = arith.constant 2 : index
    %c0_2 = arith.constant 0 : index
    %2 = vector.load %arg10[%c2, %c0_2] : memref<5x384xf32, #tpu.memory_space<vmem>>, vector<1x384xf32>
    %c3 = arith.constant 3 : index
    %c0_3 = arith.constant 0 : index
    %3 = vector.load %arg10[%c3, %c0_3] : memref<5x384xf32, #tpu.memory_space<vmem>>, vector<1x384xf32>
    %c4 = arith.constant 4 : index
    %c0_4 = arith.constant 0 : index
    %4 = vector.load %arg10[%c4, %c0_4] : memref<5x384xf32, #tpu.memory_space<vmem>>, vector<1x384xf32>
    %cst = arith.constant 0.000000e+00 : f32
    %5 = vector.broadcast %cst : f32 to vector<24x19xf32>
    %c0_5 = arith.constant 0 : index
    %c0_6 = arith.constant 0 : index
    %6 = vector.load %arg12[%c0_5, %c0_6] : memref<24x422xf32, #tpu.memory_space<vmem>>, vector<24x19xf32>
    tpu.vector_store %arg12[%c0_5, %c0_6], %5 {strides = array<i32>} : memref<24x422xf32, #tpu.memory_space<vmem>>, vector<24x19xf32>,
    %cst_7 = arith.constant 0.000000e+00 : f32
    %7 = vector.broadcast %cst_7 : f32 to vector<24x19xf32>
    %c0_8 = arith.constant 0 : index
    %c403 = arith.constant 403 : index
    %8 = vector.load %arg12[%c0_8, %c403] : memref<24x422xf32, #tpu.memory_space<vmem>>, vector<24x19xf32>
    tpu.vector_store %arg12[%c0_8, %c403], %7 {strides = array<i32>} : memref<24x422xf32, #tpu.memory_space<vmem>>, vector<24x19xf32>,
    %cst_9 = arith.constant 0.000000e+00 : f32
    %9 = vector.broadcast %cst_9 : f32 to vector<8x38xf32>
    %c0_10 = arith.constant 0 : index
    %c0_11 = arith.constant 0 : index
    %10 = vector.load %arg13[%c0_10, %c0_11] : memref<8x460xf32, #tpu.memory_space<vmem>>, vector<8x38xf32>
    tpu.vector_store %arg13[%c0_10, %c0_11], %9 {strides = array<i32>} : memref<8x460xf32, #tpu.memory_space<vmem>>, vector<8x38xf32>,
    %cst_12 = arith.constant 0.000000e+00 : f32
    %11 = vector.broadcast %cst_12 : f32 to vector<8x38xf32>
    %c0_13 = arith.constant 0 : index
    %c422 = arith.constant 422 : index
    %12 = vector.load %arg13[%c0_13, %c422] : memref<8x460xf32, #tpu.memory_space<vmem>>, vector<8x38xf32>
    tpu.vector_store %arg13[%c0_13, %c422], %11 {strides = array<i32>} : memref<8x460xf32, #tpu.memory_space<vmem>>, vector<8x38xf32>,
    %cst_14 = arith.constant 0.000000e+00 : f32
    %13 = vector.broadcast %cst_14 : f32 to vector<16x19xf32>
    %c0_15 = arith.constant 0 : index
    %c0_16 = arith.constant 0 : index
    %14 = vector.load %arg14[%c0_15, %c0_16] : memref<16x422xf32, #tpu.memory_space<vmem>>, vector<16x19xf32>
    tpu.vector_store %arg14[%c0_15, %c0_16], %13 {strides = array<i32>} : memref<16x422xf32, #tpu.memory_space<vmem>>, vector<16x19xf32>,
    %cst_17 = arith.constant 0.000000e+00 : f32
    %15 = vector.broadcast %cst_17 : f32 to vector<16x19xf32>
    %c0_18 = arith.constant 0 : index
    %c403_19 = arith.constant 403 : index
    %16 = vector.load %arg14[%c0_18, %c403_19] : memref<16x422xf32, #tpu.memory_space<vmem>>, vector<16x19xf32>
    tpu.vector_store %arg14[%c0_18, %c403_19], %15 {strides = array<i32>} : memref<16x422xf32, #tpu.memory_space<vmem>>, vector<16x19xf32>,
    %c0_20 = arith.constant 0 : index
    %c0_21 = arith.constant 0 : index
    %c0_22 = arith.constant 0 : index
    %17 = vector.load %arg1[%c0_20, %c0_21, %c0_22] : memref<1x8x422xf32, #tpu.memory_space<vmem>>, vector<1x8x422xf32>
    %18 = vector.shape_cast %17 : vector<1x8x422xf32> to vector<8x422xf32>
    %19 = vector.extract_strided_slice %18 {offsets = [0, 0], sizes = [8, 384], strides = [1, 1]} : vector<8x422xf32> to vector<8x384xf32>
    %c0_23 = arith.constant 0 : index
    %c0_24 = arith.constant 0 : index
    %20 = vector.load %arg15[%c0_23, %c0_24] : memref<216x384xf32, #tpu.memory_space<vmem>>, vector<8x384xf32>
    tpu.vector_store %arg15[%c0_23, %c0_24], %19 {strides = array<i32>} : memref<216x384xf32, #tpu.memory_space<vmem>>, vector<8x384xf32>,
    %21 = vector.extract_strided_slice %18 {offsets = [0, 1], sizes = [8, 384], strides = [1, 1]} : vector<8x422xf32> to vector<8x384xf32>
    %c8 = arith.constant 8 : index
    %c0_25 = arith.constant 0 : index
    %22 = vector.load %arg15[%c8, %c0_25] : memref<216x384xf32, #tpu.memory_space<vmem>>, vector<8x384xf32>
    tpu.vector_store %arg15[%c8, %c0_25], %21 {strides = array<i32>} : memref<216x384xf32, #tpu.memory_space<vmem>>, vector<8x384xf32>,
    %23 = vector.extract_strided_slice %18 {offsets = [0, 2], sizes = [8, 384], strides = [1, 1]} : vector<8x422xf32> to vector<8x384xf32>
    %c16 = arith.constant 16 : index
    %c0_26 = arith.constant 0 : index
    %24 = vector.load %arg15[%c16, %c0_26] : memref<216x384xf32, #tpu.memory_space<vmem>>, vector<8x384xf32>
    tpu.vector_store %arg15[%c16, %c0_26], %23 {strides = array<i32>} : memref<216x384xf32, #tpu.memory_space<vmem>>, vector<8x384xf32>,
    %25 = vector.extract_strided_slice %18 {offsets = [0, 18], sizes = [8, 384], strides = [1, 1]} : vector<8x422xf32> to vector<8x384xf32>
    %c24 = arith.constant 24 : index
    %c0_27 = arith.constant 0 : index
    %26 = vector.load %arg15[%c24, %c0_27] : memref<216x384xf32, #tpu.memory_space<vmem>>, vector<8x384xf32>
    tpu.vector_store %arg15[%c24, %c0_27], %25 {strides = array<i32>} : memref<216x384xf32, #tpu.memory_space<vmem>>, vector<8x384xf32>,
    %27 = vector.extract_strided_slice %18 {offsets = [0, 19], sizes = [8, 384], strides = [1, 1]} : vector<8x422xf32> to vector<8x384xf32>
    %c32 = arith.constant 32 : index
    %c0_28 = arith.constant 0 : index
    %28 = vector.load %arg15[%c32, %c0_28] : memref<216x384xf32, #tpu.memory_space<vmem>>, vector<8x384xf32>
    tpu.vector_store %arg15[%c32, %c0_28], %27 {strides = array<i32>} : memref<216x384xf32, #tpu.memory_space<vmem>>, vector<8x384xf32>,
    %29 = vector.extract_strided_slice %18 {offsets = [0, 20], sizes = [8, 384], strides = [1, 1]} : vector<8x422xf32> to vector<8x384xf32>
    %c40 = arith.constant 40 : index
    %c0_29 = arith.constant 0 : index
    %30 = vector.load %arg15[%c40, %c0_29] : memref<216x384xf32, #tpu.memory_space<vmem>>, vector<8x384xf32>
    tpu.vector_store %arg15[%c40, %c0_29], %29 {strides = array<i32>} : memref<216x384xf32, #tpu.memory_space<vmem>>, vector<8x384xf32>,
    %31 = vector.extract_strided_slice %18 {offsets = [0, 36], sizes = [8, 384], strides = [1, 1]} : vector<8x422xf32> to vector<8x384xf32>
    %c48 = arith.constant 48 : index
    %c0_30 = arith.constant 0 : index
    %32 = vector.load %arg15[%c48, %c0_30] : memref<216x384xf32, #tpu.memory_space<vmem>>, vector<8x384xf32>
    tpu.vector_store %arg15[%c48, %c0_30], %31 {strides = array<i32>} : memref<216x384xf32, #tpu.memory_space<vmem>>, vector<8x384xf32>,
    %33 = vector.extract_strided_slice %18 {offsets = [0, 37], sizes = [8, 384], strides = [1, 1]} : vector<8x422xf32> to vector<8x384xf32>
    %c56 = arith.constant 56 : index
    %c0_31 = arith.constant 0 : index
    %34 = vector.load %arg15[%c56, %c0_31] : memref<216x384xf32, #tpu.memory_space<vmem>>, vector<8x384xf32>
    tpu.vector_store %arg15[%c56, %c0_31], %33 {strides = array<i32>} : memref<216x384xf32, #tpu.memory_space<vmem>>, vector<8x384xf32>,
    %35 = vector.extract_strided_slice %18 {offsets = [0, 38], sizes = [8, 384], strides = [1, 1]} : vector<8x422xf32> to vector<8x384xf32>
    %c64 = arith.constant 64 : index
    %c0_32 = arith.constant 0 : index
    %36 = vector.load %arg15[%c64, %c0_32] : memref<216x384xf32, #tpu.memory_space<vmem>>, vector<8x384xf32>
    tpu.vector_store %arg15[%c64, %c0_32], %35 {strides = array<i32>} : memref<216x384xf32, #tpu.memory_space<vmem>>, vector<8x384xf32>,
    %c0_33 = arith.constant 0 : index
    %c0_34 = arith.constant 0 : index
    %37 = vector.load %arg15[%c0_33, %c0_34] : memref<216x384xf32, #tpu.memory_space<vmem>>, vector<72x384xf32>
    %38 = arith.truncf %37 : vector<72x384xf32> to vector<72x384xbf16>
    %c0_35 = arith.constant 0 : index
    %c0_36 = arith.constant 0 : index
    %39 = vector.load %arg2[%c0_35, %c0_36] : memref<8x72xbf16, #tpu.memory_space<vmem>>, vector<8x72xbf16>
    %cst_37 = arith.constant dense<0.000000e+00> : vector<8x384xf32>
    %40 = tpu.matmul %39, %38, %cst_37 {dimension_numbers = #tpu.dot_dimension_numbers<[1], [0], [0], [1], [0, 0, 1, 1], [], []>} : vector<8x72xbf16>, vector<72x384xbf16>, vector<8x384xf32> -> vector<8x384xf32>
    %c0_38 = arith.constant 0 : index
    %c0_39 = arith.constant 0 : index
    %41 = vector.load %arg3[%c0_38, %c0_39] : memref<8x1xf32, #tpu.memory_space<vmem>>, vector<8x1xf32>
    %42 = vector.broadcast %41 : vector<8x1xf32> to vector<8x384xf32>
    %43 = arith.addf %40, %42 : vector<8x384xf32>
    %cst_40 = arith.constant 0.000000e+00 : f32
    %44 = vector.broadcast %cst_40 : f32 to vector<8x384xf32>
    %45 = arith.maximumf %43, %44 : vector<8x384xf32>
    %46 = vector.broadcast %0 : vector<1x384xf32> to vector<8x384xf32>
    %47 = arith.mulf %45, %46 : vector<8x384xf32>
    %c16_41 = arith.constant 16 : index
    %c19 = arith.constant 19 : index
    %48 = vector.load %arg12[%c16_41, %c19] : memref<24x422xf32, #tpu.memory_space<vmem>>, vector<8x384xf32>
    tpu.vector_store %arg12[%c16_41, %c19], %47 {strides = array<i32>} : memref<24x422xf32, #tpu.memory_space<vmem>>, vector<8x384xf32>,
    %c16_42 = arith.constant 16 : index
    %c0_43 = arith.constant 0 : index
    %49 = vector.load %arg12[%c16_42, %c0_43] : memref<24x422xf32, #tpu.memory_space<vmem>>, vector<8x422xf32>
    %50 = vector.extract_strided_slice %49 {offsets = [0, 19], sizes = [8, 384], strides = [1, 1]} : vector<8x422xf32> to vector<8x384xf32>
    %51 = vector.extract_strided_slice %49 {offsets = [0, 20], sizes = [8, 384], strides = [1, 1]} : vector<8x422xf32> to vector<8x384xf32>
    %52 = arith.maximumf %50, %51 : vector<8x384xf32>
    %53 = vector.extract_strided_slice %49 {offsets = [0, 37], sizes = [8, 384], strides = [1, 1]} : vector<8x422xf32> to vector<8x384xf32>
    %54 = vector.extract_strided_slice %49 {offsets = [0, 38], sizes = [8, 384], strides = [1, 1]} : vector<8x422xf32> to vector<8x384xf32>
    %55 = arith.maximumf %53, %54 : vector<8x384xf32>
    %56 = arith.maximumf %52, %55 : vector<8x384xf32>
    %c0_44 = arith.constant 0 : index
    %c38 = arith.constant 38 : index
    %57 = vector.load %arg13[%c0_44, %c38] : memref<8x460xf32, #tpu.memory_space<vmem>>, vector<8x384xf32>
    tpu.vector_store %arg13[%c0_44, %c38], %56 {strides = array<i32>} : memref<8x460xf32, #tpu.memory_space<vmem>>, vector<8x384xf32>,
    %c0_45 = arith.constant 0 : index
    %c0_46 = arith.constant 0 : index
    %58 = vector.load %arg13[%c0_45, %c0_46] : memref<8x460xf32, #tpu.memory_space<vmem>>, vector<8x460xf32>
    %59 = vector.extract_strided_slice %58 {offsets = [0, 0], sizes = [8, 384], strides = [1, 1]} : vector<8x460xf32> to vector<8x384xf32>
    %c0_47 = arith.constant 0 : index
    %c0_48 = arith.constant 0 : index
    %60 = vector.load %arg15[%c0_47, %c0_48] : memref<216x384xf32, #tpu.memory_space<vmem>>, vector<8x384xf32>
    tpu.vector_store %arg15[%c0_47, %c0_48], %59 {strides = array<i32>} : memref<216x384xf32, #tpu.memory_space<vmem>>, vector<8x384xf32>,
    %61 = vector.extract_strided_slice %58 {offsets = [0, 2], sizes = [8, 384], strides = [1, 1]} : vector<8x460xf32> to vector<8x384xf32>
    %c8_49 = arith.constant 8 : index
    %c0_50 = arith.constant 0 : index
    %62 = vector.load %arg15[%c8_49, %c0_50] : memref<216x384xf32, #tpu.memory_space<vmem>>, vector<8x384xf32>
    tpu.vector_store %arg15[%c8_49, %c0_50], %61 {strides = array<i32>} : memref<216x384xf32, #tpu.memory_space<vmem>>, vector<8x384xf32>,
    %63 = vector.extract_strided_slice %58 {offsets = [0, 4], sizes = [8, 384], strides = [1, 1]} : vector<8x460xf32> to vector<8x384xf32>
    %c16_51 = arith.constant 16 : index
    %c0_52 = arith.constant 0 : index
    %64 = vector.load %arg15[%c16_51, %c0_52] : memref<216x384xf32, #tpu.memory_space<vmem>>, vector<8x384xf32>
    tpu.vector_store %arg15[%c16_51, %c0_52], %63 {strides = array<i32>} : memref<216x384xf32, #tpu.memory_space<vmem>>, vector<8x384xf32>,
    %65 = vector.extract_strided_slice %58 {offsets = [0, 36], sizes = [8, 384], strides = [1, 1]} : vector<8x460xf32> to vector<8x384xf32>
    %c24_53 = arith.constant 24 : index
    %c0_54 = arith.constant 0 : index
    %66 = vector.load %arg15[%c24_53, %c0_54] : memref<216x384xf32, #tpu.memory_space<vmem>>, vector<8x384xf32>
    tpu.vector_store %arg15[%c24_53, %c0_54], %65 {strides = array<i32>} : memref<216x384xf32, #tpu.memory_space<vmem>>, vector<8x384xf32>,
    %67 = vector.extract_strided_slice %58 {offsets = [0, 38], sizes = [8, 384], strides = [1, 1]} : vector<8x460xf32> to vector<8x384xf32>
    %c32_55 = arith.constant 32 : index
    %c0_56 = arith.constant 0 : index
    %68 = vector.load %arg15[%c32_55, %c0_56] : memref<216x384xf32, #tpu.memory_space<vmem>>, vector<8x384xf32>
    tpu.vector_store %arg15[%c32_55, %c0_56], %67 {strides = array<i32>} : memref<216x384xf32, #tpu.memory_space<vmem>>, vector<8x384xf32>,
    %69 = vector.extract_strided_slice %58 {offsets = [0, 40], sizes = [8, 384], strides = [1, 1]} : vector<8x460xf32> to vector<8x384xf32>
    %c40_57 = arith.constant 40 : index
    %c0_58 = arith.constant 0 : index
    %70 = vector.load %arg15[%c40_57, %c0_58] : memref<216x384xf32, #tpu.memory_space<vmem>>, vector<8x384xf32>
    tpu.vector_store %arg15[%c40_57, %c0_58], %69 {strides = array<i32>} : memref<216x384xf32, #tpu.memory_space<vmem>>, vector<8x384xf32>,
    %71 = vector.extract_strided_slice %58 {offsets = [0, 72], sizes = [8, 384], strides = [1, 1]} : vector<8x460xf32> to vector<8x384xf32>
    %c48_59 = arith.constant 48 : index
    %c0_60 = arith.constant 0 : index
    %72 = vector.load %arg15[%c48_59, %c0_60] : memref<216x384xf32, #tpu.memory_space<vmem>>, vector<8x384xf32>
    tpu.vector_store %arg15[%c48_59, %c0_60], %71 {strides = array<i32>} : memref<216x384xf32, #tpu.memory_space<vmem>>, vector<8x384xf32>,
    %73 = vector.extract_strided_slice %58 {offsets = [0, 74], sizes = [8, 384], strides = [1, 1]} : vector<8x460xf32> to vector<8x384xf32>
    %c56_61 = arith.constant 56 : index
    %c0_62 = arith.constant 0 : index
    %74 = vector.load %arg15[%c56_61, %c0_62] : memref<216x384xf32, #tpu.memory_space<vmem>>, vector<8x384xf32>
    tpu.vector_store %arg15[%c56_61, %c0_62], %73 {strides = array<i32>} : memref<216x384xf32, #tpu.memory_space<vmem>>, vector<8x384xf32>,
    %75 = vector.extract_strided_slice %58 {offsets = [0, 76], sizes = [8, 384], strides = [1, 1]} : vector<8x460xf32> to vector<8x384xf32>
    %c64_63 = arith.constant 64 : index
    %c0_64 = arith.constant 0 : index
    %76 = vector.load %arg15[%c64_63, %c0_64] : memref<216x384xf32, #tpu.memory_space<vmem>>, vector<8x384xf32>
    tpu.vector_store %arg15[%c64_63, %c0_64], %75 {strides = array<i32>} : memref<216x384xf32, #tpu.memory_space<vmem>>, vector<8x384xf32>,
    %c0_65 = arith.constant 0 : index
    %c0_66 = arith.constant 0 : index
    %77 = vector.load %arg15[%c0_65, %c0_66] : memref<216x384xf32, #tpu.memory_space<vmem>>, vector<72x384xf32>
    %78 = arith.truncf %77 : vector<72x384xf32> to vector<72x384xbf16>
    %c0_67 = arith.constant 0 : index
    %c0_68 = arith.constant 0 : index
    %79 = vector.load %arg4[%c0_67, %c0_68] : memref<16x72xbf16, #tpu.memory_space<vmem>>, vector<16x72xbf16>
    %cst_69 = arith.constant dense<0.000000e+00> : vector<16x384xf32>
    %80 = tpu.matmul %79, %78, %cst_69 {dimension_numbers = #tpu.dot_dimension_numbers<[1], [0], [0], [1], [0, 0, 1, 1], [], []>} : vector<16x72xbf16>, vector<72x384xbf16>, vector<16x384xf32> -> vector<16x384xf32>
    %c0_70 = arith.constant 0 : index
    %c0_71 = arith.constant 0 : index
    %81 = vector.load %arg5[%c0_70, %c0_71] : memref<16x1xf32, #tpu.memory_space<vmem>>, vector<16x1xf32>
    %82 = vector.broadcast %81 : vector<16x1xf32> to vector<16x384xf32>
    %83 = arith.addf %80, %82 : vector<16x384xf32>
    %cst_72 = arith.constant 0.000000e+00 : f32
    %84 = vector.broadcast %cst_72 : f32 to vector<16x384xf32>
    %85 = arith.maximumf %83, %84 : vector<16x384xf32>
    %c0_73 = arith.constant 0 : index
    %c19_74 = arith.constant 19 : index
    %86 = vector.load %arg14[%c0_73, %c19_74] : memref<16x422xf32, #tpu.memory_space<vmem>>, vector<16x384xf32>
    tpu.vector_store %arg14[%c0_73, %c19_74], %85 {strides = array<i32>} : memref<16x422xf32, #tpu.memory_space<vmem>>, vector<16x384xf32>,
    %c0_75 = arith.constant 0 : index
    %c0_76 = arith.constant 0 : index
    %87 = vector.load %arg14[%c0_75, %c0_76] : memref<16x422xf32, #tpu.memory_space<vmem>>, vector<16x422xf32>
    %88 = vector.extract_strided_slice %87 {offsets = [0, 19], sizes = [16, 384], strides = [1, 1]} : vector<16x422xf32> to vector<16x384xf32>
    %89 = vector.broadcast %1 : vector<1x384xf32> to vector<16x384xf32>
    %90 = arith.mulf %89, %88 : vector<16x384xf32>
    %91 = vector.extract_strided_slice %87 {offsets = [0, 18], sizes = [16, 384], strides = [1, 1]} : vector<16x422xf32> to vector<16x384xf32>
    %92 = vector.broadcast %2 : vector<1x384xf32> to vector<16x384xf32>
    %93 = arith.mulf %92, %91 : vector<16x384xf32>
    %94 = arith.addf %90, %93 : vector<16x384xf32>
    %95 = vector.extract_strided_slice %87 {offsets = [0, 1], sizes = [16, 384], strides = [1, 1]} : vector<16x422xf32> to vector<16x384xf32>
    %96 = vector.broadcast %3 : vector<1x384xf32> to vector<16x384xf32>
    %97 = arith.mulf %96, %95 : vector<16x384xf32>
    %98 = arith.addf %94, %97 : vector<16x384xf32>
    %99 = vector.extract_strided_slice %87 {offsets = [0, 0], sizes = [16, 384], strides = [1, 1]} : vector<16x422xf32> to vector<16x384xf32>
    %100 = vector.broadcast %4 : vector<1x384xf32> to vector<16x384xf32>
    %101 = arith.mulf %100, %99 : vector<16x384xf32>
    %102 = arith.addf %98, %101 : vector<16x384xf32>
    %c0_77 = arith.constant 0 : index
    %c19_78 = arith.constant 19 : index
    %103 = vector.load %arg12[%c0_77, %c19_78] : memref<24x422xf32, #tpu.memory_space<vmem>>, vector<16x384xf32>
    tpu.vector_store %arg12[%c0_77, %c19_78], %102 {strides = array<i32>} : memref<24x422xf32, #tpu.memory_space<vmem>>, vector<16x384xf32>,
    %c0_79 = arith.constant 0 : index
    %c0_80 = arith.constant 0 : index
    %104 = vector.load %arg12[%c0_79, %c0_80] : memref<24x422xf32, #tpu.memory_space<vmem>>, vector<24x422xf32>
    %105 = vector.extract_strided_slice %104 {offsets = [0, 0], sizes = [24, 384], strides = [1, 1]} : vector<24x422xf32> to vector<24x384xf32>
    %c0_81 = arith.constant 0 : index
    %c0_82 = arith.constant 0 : index
    %106 = vector.load %arg15[%c0_81, %c0_82] : memref<216x384xf32, #tpu.memory_space<vmem>>, vector<24x384xf32>
    tpu.vector_store %arg15[%c0_81, %c0_82], %105 {strides = array<i32>} : memref<216x384xf32, #tpu.memory_space<vmem>>, vector<24x384xf32>,
    %107 = vector.extract_strided_slice %104 {offsets = [0, 1], sizes = [24, 384], strides = [1, 1]} : vector<24x422xf32> to vector<24x384xf32>
    %c24_83 = arith.constant 24 : index
    %c0_84 = arith.constant 0 : index
    %108 = vector.load %arg15[%c24_83, %c0_84] : memref<216x384xf32, #tpu.memory_space<vmem>>, vector<24x384xf32>
    tpu.vector_store %arg15[%c24_83, %c0_84], %107 {strides = array<i32>} : memref<216x384xf32, #tpu.memory_space<vmem>>, vector<24x384xf32>,
    %109 = vector.extract_strided_slice %104 {offsets = [0, 2], sizes = [24, 384], strides = [1, 1]} : vector<24x422xf32> to vector<24x384xf32>
    %c48_85 = arith.constant 48 : index
    %c0_86 = arith.constant 0 : index
    %110 = vector.load %arg15[%c48_85, %c0_86] : memref<216x384xf32, #tpu.memory_space<vmem>>, vector<24x384xf32>
    tpu.vector_store %arg15[%c48_85, %c0_86], %109 {strides = array<i32>} : memref<216x384xf32, #tpu.memory_space<vmem>>, vector<24x384xf32>,
    %111 = vector.extract_strided_slice %104 {offsets = [0, 18], sizes = [24, 384], strides = [1, 1]} : vector<24x422xf32> to vector<24x384xf32>
    %c72 = arith.constant 72 : index
    %c0_87 = arith.constant 0 : index
    %112 = vector.load %arg15[%c72, %c0_87] : memref<216x384xf32, #tpu.memory_space<vmem>>, vector<24x384xf32>
    tpu.vector_store %arg15[%c72, %c0_87], %111 {strides = array<i32>} : memref<216x384xf32, #tpu.memory_space<vmem>>, vector<24x384xf32>,
    %113 = vector.extract_strided_slice %104 {offsets = [0, 19], sizes = [24, 384], strides = [1, 1]} : vector<24x422xf32> to vector<24x384xf32>
    %c96 = arith.constant 96 : index
    %c0_88 = arith.constant 0 : index
    %114 = vector.load %arg15[%c96, %c0_88] : memref<216x384xf32, #tpu.memory_space<vmem>>, vector<24x384xf32>
    tpu.vector_store %arg15[%c96, %c0_88], %113 {strides = array<i32>} : memref<216x384xf32, #tpu.memory_space<vmem>>, vector<24x384xf32>,
    %115 = vector.extract_strided_slice %104 {offsets = [0, 20], sizes = [24, 384], strides = [1, 1]} : vector<24x422xf32> to vector<24x384xf32>
    %c120 = arith.constant 120 : index
    %c0_89 = arith.constant 0 : index
    %116 = vector.load %arg15[%c120, %c0_89] : memref<216x384xf32, #tpu.memory_space<vmem>>, vector<24x384xf32>
    tpu.vector_store %arg15[%c120, %c0_89], %115 {strides = array<i32>} : memref<216x384xf32, #tpu.memory_space<vmem>>, vector<24x384xf32>,
    %117 = vector.extract_strided_slice %104 {offsets = [0, 36], sizes = [24, 384], strides = [1, 1]} : vector<24x422xf32> to vector<24x384xf32>
    %c144 = arith.constant 144 : index
    %c0_90 = arith.constant 0 : index
    %118 = vector.load %arg15[%c144, %c0_90] : memref<216x384xf32, #tpu.memory_space<vmem>>, vector<24x384xf32>
    tpu.vector_store %arg15[%c144, %c0_90], %117 {strides = array<i32>} : memref<216x384xf32, #tpu.memory_space<vmem>>, vector<24x384xf32>,
    %119 = vector.extract_strided_slice %104 {offsets = [0, 37], sizes = [24, 384], strides = [1, 1]} : vector<24x422xf32> to vector<24x384xf32>
    %c168 = arith.constant 168 : index
    %c0_91 = arith.constant 0 : index
    %120 = vector.load %arg15[%c168, %c0_91] : memref<216x384xf32, #tpu.memory_space<vmem>>, vector<24x384xf32>
    tpu.vector_store %arg15[%c168, %c0_91], %119 {strides = array<i32>} : memref<216x384xf32, #tpu.memory_space<vmem>>, vector<24x384xf32>,
    %121 = vector.extract_strided_slice %104 {offsets = [0, 38], sizes = [24, 384], strides = [1, 1]} : vector<24x422xf32> to vector<24x384xf32>
    %c192 = arith.constant 192 : index
    %c0_92 = arith.constant 0 : index
    %122 = vector.load %arg15[%c192, %c0_92] : memref<216x384xf32, #tpu.memory_space<vmem>>, vector<24x384xf32>
    tpu.vector_store %arg15[%c192, %c0_92], %121 {strides = array<i32>} : memref<216x384xf32, #tpu.memory_space<vmem>>, vector<24x384xf32>,
    %c0_93 = arith.constant 0 : index
    %c0_94 = arith.constant 0 : index
    %123 = vector.load %arg15[%c0_93, %c0_94] : memref<216x384xf32, #tpu.memory_space<vmem>>, vector<216x384xf32>
    %124 = arith.truncf %123 : vector<216x384xf32> to vector<216x384xbf16>
    %c0_95 = arith.constant 0 : index
    %c0_96 = arith.constant 0 : index
    %125 = vector.load %arg6[%c0_95, %c0_96] : memref<8x216xbf16, #tpu.memory_space<vmem>>, vector<8x216xbf16>
    %cst_97 = arith.constant dense<0.000000e+00> : vector<8x384xf32>
    %126 = tpu.matmul %125, %124, %cst_97 {dimension_numbers = #tpu.dot_dimension_numbers<[1], [0], [0], [1], [0, 0, 1, 1], [], []>} : vector<8x216xbf16>, vector<216x384xbf16>, vector<8x384xf32> -> vector<8x384xf32>
    %c0_98 = arith.constant 0 : index
    %c0_99 = arith.constant 0 : index
    %127 = vector.load %arg7[%c0_98, %c0_99] : memref<8x1xf32, #tpu.memory_space<vmem>>, vector<8x1xf32>
    %128 = vector.broadcast %127 : vector<8x1xf32> to vector<8x384xf32>
    %129 = arith.addf %126, %128 : vector<8x384xf32>
    %cst_100 = arith.constant 0.000000e+00 : f32
    %130 = vector.broadcast %cst_100 : f32 to vector<8x384xf32>
    %131 = arith.maximumf %129, %130 : vector<8x384xf32>
    %c0_101 = arith.constant 0 : index
    %c0_102 = arith.constant 0 : index
    %132 = vector.load %arg8[%c0_101, %c0_102] : memref<8x1xf32, #tpu.memory_space<vmem>>, vector<8x1xf32>
    %133 = vector.broadcast %132 : vector<8x1xf32> to vector<8x384xf32>
    %134 = arith.mulf %131, %133 : vector<8x384xf32>
    %cst_103 = arith.constant dense<0.000000e+00> : vector<384xf32>
    %135 = vector.multi_reduction <add>, %134, %cst_103 [0] : vector<8x384xf32> to vector<384xf32>
    %136 = vector.shape_cast %135 : vector<384xf32> to vector<1x384xf32>
    %c0_104 = arith.constant 0 : index
    %c0_105 = arith.constant 0 : index
    %137 = vector.load %arg9[%c0_104, %c0_105] : memref<1x1xf32, #tpu.memory_space<vmem>>, vector<1x1xf32>
    %138 = vector.broadcast %137 : vector<1x1xf32> to vector<1x384xf32>
    %139 = arith.addf %136, %138 : vector<1x384xf32>
    %cst_106 = arith.constant 0.000000e+00 : f32
    %140 = vector.broadcast %cst_106 : f32 to vector<1x384xf32>
    %141 = arith.subf %140, %139 : vector<1x384xf32>
    %142 = math.exp %141 : vector<1x384xf32>
    %cst_107 = arith.constant 1.000000e+00 : f32
    %143 = vector.broadcast %cst_107 : f32 to vector<1x384xf32>
    %144 = arith.addf %143, %142 : vector<1x384xf32>
    %cst_108 = arith.constant 1.000000e+00 : f32
    %145 = vector.broadcast %cst_108 : f32 to vector<1x384xf32>
    %146 = arith.divf %145, %144 : vector<1x384xf32>
    %c0_109 = arith.constant 0 : index
    %c0_110 = arith.constant 0 : index
    %c0_111 = arith.constant 0 : index
    %147 = vector.load %arg11[%c0_109, %c0_110, %c0_111] : memref<1x1x384xf32, #tpu.memory_space<vmem>>, vector<1x1x384xf32>
    %148 = vector.shape_cast %147 : vector<1x1x384xf32> to vector<1x384xf32>
    %149 = vector.shape_cast %146 : vector<1x384xf32> to vector<1x1x384xf32>
    tpu.vector_store %arg11[%c0_109, %c0_110, %c0_111], %149 {strides = array<i32>} : memref<1x1x384xf32, #tpu.memory_space<vmem>>, vector<1x1x384xf32>,
    return
  }
  func.func @transform_0(%arg0: i32) -> (i32, i32, i32) {
    %c0_i32 = arith.constant 0 : i32
    %c0_i32_0 = arith.constant 0 : i32
    %c0_i32_1 = arith.constant 0 : i32
    return %arg0, %c0_i32, %c0_i32_0 : i32, i32, i32
  }
  func.func @transform_1(%arg0: i32) -> (i32, i32) {
    %c0_i32 = arith.constant 0 : i32
    %c0_i32_0 = arith.constant 0 : i32
    %c0_i32_1 = arith.constant 0 : i32
    return %c0_i32, %c0_i32_0 : i32, i32
  }
  func.func @transform_2(%arg0: i32) -> (i32, i32) {
    %c0_i32 = arith.constant 0 : i32
    %c0_i32_0 = arith.constant 0 : i32
    %c0_i32_1 = arith.constant 0 : i32
    return %c0_i32, %c0_i32_0 : i32, i32
  }
  func.func @transform_3(%arg0: i32) -> (i32, i32) {
    %c0_i32 = arith.constant 0 : i32
    %c0_i32_0 = arith.constant 0 : i32
    %c0_i32_1 = arith.constant 0 : i32
    return %c0_i32, %c0_i32_0 : i32, i32
  }
  func.func @transform_4(%arg0: i32) -> (i32, i32) {
    %c0_i32 = arith.constant 0 : i32
    %c0_i32_0 = arith.constant 0 : i32
    %c0_i32_1 = arith.constant 0 : i32
    return %c0_i32, %c0_i32_0 : i32, i32
  }
  func.func @transform_5(%arg0: i32) -> (i32, i32) {
    %c0_i32 = arith.constant 0 : i32
    %c0_i32_0 = arith.constant 0 : i32
    %c0_i32_1 = arith.constant 0 : i32
    return %c0_i32, %c0_i32_0 : i32, i32
  }
  func.func @transform_6(%arg0: i32) -> (i32, i32) {
    %c0_i32 = arith.constant 0 : i32
    %c0_i32_0 = arith.constant 0 : i32
    %c0_i32_1 = arith.constant 0 : i32
    return %c0_i32, %c0_i32_0 : i32, i32
  }
  func.func @transform_7(%arg0: i32) -> (i32, i32) {
    %c0_i32 = arith.constant 0 : i32
    %c0_i32_0 = arith.constant 0 : i32
    %c0_i32_1 = arith.constant 0 : i32
    return %c0_i32, %c0_i32_0 : i32, i32
  }
  func.func @transform_8(%arg0: i32) -> (i32, i32) {
    %c0_i32 = arith.constant 0 : i32
    %c0_i32_0 = arith.constant 0 : i32
    %c0_i32_1 = arith.constant 0 : i32
    return %c0_i32, %c0_i32_0 : i32, i32
  }
  func.func @transform_9(%arg0: i32) -> (i32, i32) {
    %c0_i32 = arith.constant 0 : i32
    %c0_i32_0 = arith.constant 0 : i32
    %c0_i32_1 = arith.constant 0 : i32
    return %c0_i32, %c0_i32_0 : i32, i32
  }
  func.func @transform_10(%arg0: i32) -> (i32, i32, i32) {
    %c0_i32 = arith.constant 0 : i32
    %c0_i32_0 = arith.constant 0 : i32
    %c0_i32_1 = arith.constant 0 : i32
    return %arg0, %c0_i32, %c0_i32_0 : i32, i32, i32
  }
}

</mosaic_0001>

<bundles_post_ra>
// kernel: unet_with_sigmoid.1
= control target key start
LH: loop header
LB: loop body
LE: loop exit
PB: predicated region body
PF: predicated region fallthrough
CT: control target
= control target key end

     0   :  { %s2805_s15 = smov 0   ;;  %s3542_s0 = inlined_call_operand.vmem [shape: f32[2,8,422], index: 0, kind: input, shape index: {}]   ;;  %s3543_s1 = inlined_call_operand.vmem [shape: bf16[8,72], index: 1, kind: input, shape index: {}]   ;;  %s3544_s2 = inlined_call_operand.vmem [shape: f32[8,1], index: 2, kind: input, shape index: {}]   ;;  %s3545_s3 = inlined_call_operand.vmem [shape: bf16[16,72], index: 3, kind: input, shape index: {}]   ;;  %s3546_s4 = inlined_call_operand.vmem [shape: f32[16,1], index: 4, kind: input, shape index: {}]   ;;  %s3547_s5 = inlined_call_operand.vmem [shape: bf16[8,216], index: 5, kind: input, shape index: {}]   ;;  %s3548_s6 = inlined_call_operand.vmem [shape: f32[8,1], index: 6, kind: input, shape index: {}]   ;;  %s3549_s7 = inlined_call_operand.vmem [shape: f32[8,1], index: 7, kind: input, shape index: {}]   ;;  %s3550_s8 = inlined_call_operand.<no memory space> [shape: f32[1,1], index: 8, kind: input, shape index: {}]   ;;  %s3551_s9 = inlined_call_operand.vmem [shape: f32[5,384], index: 9, kind: input, shape index: {}]   ;;  %s3552_s10 = inlined_call_operand.vmem [shape: f32[2,1,384], index: 10, kind: output, shape index: {}]  }
   0x1   :  { %v15_v0 = vstv %s3550_s8 }
   0x2   :  { %16 = vst [vmem:[#allocation6] sm:$0x1] %v15_v0 }
   0x3 LB: > { %s2214_s16 = sadd.s32 4294967295, %s2727_s15   ;;  %p2218_p0 = scmp.ge.s32.totalorder %s2727_s15, 1  ;;  %s2727_s15 = sphi %s2805_s15, %s22_s15  }
   0x4   : > { %p314_p1 = scmp.lt.s32.totalorder %s2727_s15, 3 }
   0x6   : > { %p315_p2 = pnand %p2218_p0, %p314_p1 }
   0x7   : > { %p351_p3 = scmp.lt.s32.totalorder (!%p315_p2), %s2214_s16, 1  ;;  %v2729_v1 = vmov (!%p315_p2), 0.0   ;;  %s2730_s20 = smov (!%p315_p2), 126   ;;  %v2737_v8 = vmov (!%p315_p2), 0   ;;  %vm2738_vm0 = vmmov (!%p315_p2), 0   ;;  %v584_v11 = vld [vmem:[%s3544_s2] sm:$0xff] (!%p315_p2) }
   0x8   : > { %318 = sbr.rel (%p315_p2) target bundleno = 2129 (0x851), region = 60  ;;  %2252 = vmatprep.subr.bf16.mxu1 (!%p315_p2), %v2729_v1  ;;  %s2731_s21 = smov (!%p315_p2), 127   ;;  %636 = vmatprep.mubr.bf16.mxu0 (!%p315_p2), %v2737_v8  ;;  %vm405_vm1 = vcmask (!%p315_p2), 1039360   ;;  %vm423_vm2 = vcmask (!%p315_p2), 1031168   ;;  %vm441_vm3 = vcmask (!%p315_p2), 900096   ;;  %vm459_vm4 = vcmask (!%p315_p2), 891904  }
   0x9   : > { %s2732_s22 = smov (!%p315_p2), 110   ;;  %s2733_s23 = smov (!%p315_p2), 108   ;;  %2262 = vmatprep.mubr.msk.bf16.mxu1 (!%p315_p2), %vm2738_vm0, %v2729_v1  ;;  %2387 = vset.pattern.permute.xlu0 (!%p315_p2), %v2737_v8  ;;  %vm477_vm5 = vcmask (!%p315_p2), 883712   ;;  %vm495_vm6 = vcmask (!%p315_p2), 752640   ;;  %vm513_vm7 = vcmask (!%p315_p2), 744448   ;;  %vm531_vm8 = vcmask (!%p315_p2), 736256  }
   0xa   : > { %s2734_s24 = smov (!%p315_p2), 109   ;;  %s2735_s25 = smov (!%p315_p2), 91   ;;  %2468 = vset.pattern.permute.xlu1 (!%p315_p2), %v2737_v8  ;;  %vm594_vm9 = vcmask (!%p315_p2), 1043456   ;;  %vm590_vm10 = vcmask (!%p315_p2), 588800   ;;  %vm370_vm11 = vcmask (!%p315_p2), 154624   ;;  %vm374_vm12 = vcmask (!%p315_p2), 310424  }
   0xb   : > { %s2736_s26 = smov (!%p315_p2), 92   ;;  %s2739_s27 = smov (!%p315_p2), 90   ;;  %377 = vst.msk [vmem:[#allocation2 + $0x58] sm:$0xff] (!%p315_p2), %vm374_vm12, %v2729_v1  ;;  %375 = vst.msk [vmem:[#allocation2 + $0x18] sm:$0xff] (!%p315_p2), %vm374_vm12, %v2729_v1  ;;  %vm722_vm13 = vcmask (!%p315_p2), 1047704   ;;  %vm378_vm14 = vcmask (!%p315_p2), 310272  }
   0xc   : > { %371 = vst.msk [vmem:[#allocation2] sm:$0xff] (!%p315_p2), %vm370_vm11, %v2729_v1  ;;  %372 = vst.msk [vmem:[#allocation2 + $0x20] sm:$0xff] (!%p315_p2), %vm370_vm11, %v2729_v1  ;;  %s2740_s14 = smov (!%p315_p2), 19   ;;  %vm380_vm15 = vcmask (!%p315_p2), 621872   ;;  %s2742_s17 = smov (!%p315_p2), 88  }
   0xd   : > { %373 = vst.msk [vmem:[#allocation2 + $0x40] sm:$0xff] (!%p315_p2), %vm370_vm11, %v2729_v1  ;;  %382 = vst.msk [vmem:[#allocation4] sm:$0xff] (!%p315_p2), %vm370_vm11, %v2729_v1  ;;  %s2743_s18 = smov (!%p315_p2), 56   ;;  %s2745_s28 = smov (!%p315_p2), 52  }
   0xe   : > { %376 = vst.msk [vmem:[#allocation2 + $0x38] sm:$0xff] (!%p315_p2), %vm374_vm12, %v2729_v1  ;;  %384 = vst.msk [vmem:[#allocation4 + $0x18] sm:$0xff] (!%p315_p2), %vm374_vm12, %v2729_v1 }
   0xf   : > { %s3554_s16 = smov (!%p351_p3, %s2214_s16), 1  ;;  %383 = vst.msk [vmem:[#allocation4 + $0x20] sm:$0xff] %vm370_vm11, %v2729_v1 }
  0x10   : > { %s2239_s8 = sshll.u32 %s3554_s16, 5  ;;  %385 = vst.msk [vmem:[#allocation4 + $0x38] sm:$0xff] %vm374_vm12, %v2729_v1  ;;  %vm837_vm12 = vcmask 1014784  }
  0x11   : > { %s355_s19 = scalar_lea.vmem %s3542_s0, %s2239_s8  ;;  %379 = vst.msk [vmem:[#allocation3] sm:$0xff] %vm378_vm14, %v2729_v1  ;;  %s2741_s8 = smov 124  }
  0x12   : > { %v387_v2 = vld [vmem:[%s355_s19 + $0x8] sm:$0xff]  ;;  %v2820_v3 = vld [vmem:[%s355_s19 + $0x10] sm:$0xff]  ;;  %v2822_v4 = vld [vmem:[%s355_s19] sm:$0xff]  ;;  %381 = vst.msk [vmem:[#allocation3 + $0x18] sm:$0xff] %vm380_vm15, %v2729_v1  ;;  %vm907_vm15 = vcmask 457728  }
  0x13   : > { %v2317_v5 = vpack.i.bf16 %v2820_v3, %v387_v2  ;;  %v389_v6 = vld [vmem:[%s355_s19 + $0x18] sm:$0xff]  ;;  %v2377_v10 = vpack.i.bf16 %v387_v2, %v2822_v4  ;;  %s2744_s19 = smov 54  }
  0x14   : > { %v2312_v7 = vpack.i.bf16 %v389_v6, %v2822_v4  ;;  %v2382_v9 = vpack.i.bf16 %v389_v6, %v2820_v3 }
  0x15   : > { %2318 = vrot.lane.b32.xlu1 %v2317_v5, %s2730_s20  ;;  %2308 = vrot.lane.b32.xlu0 %v2317_v5, %s2731_s21 }
  0x19   : > { %2323 = vrot.lane.b32.xlu1 %v2317_v5, %s2732_s22  ;;  %2313 = vrot.lane.b32.xlu0 %v2312_v7, %s2731_s21 }
  0x1d   : > { %2333 = vrot.lane.b32.xlu1 %v2312_v7, %s2732_s22  ;;  %2328 = vrot.lane.b32.xlu0 %v2312_v7, %s2730_s20 }
  0x21   : > { %2343 = vrot.lane.b32.xlu1 %v2317_v5, %s2733_s23  ;;  %2338 = vrot.lane.b32.xlu0 %v2317_v5, %s2734_s24 }
  0x25   : > { %2353 = vrot.lane.b32.xlu1 %v2312_v7, %s2733_s23  ;;  %2348 = vrot.lane.b32.xlu0 %v2312_v7, %s2734_s24 }
  0x29   : > { %2363 = vrot.lane.b32.xlu1 %v2317_v5, %s2735_s25  ;;  %2358 = vrot.lane.b32.xlu0 %v2317_v5, %s2736_s26 }
  0x2d   : > { %2373 = vrot.lane.b32.xlu1 %v2312_v7, %s2735_s25  ;;  %2368 = vrot.lane.b32.xlu0 %v2312_v7, %s2736_s26 }
  0x31   : > { %2383 = vrot.lane.b32.xlu1 %v2382_v9, %s2739_s27  ;;  %2378 = vrot.lane.b32.xlu0 %v2377_v10, %s2739_s27 }
  0x35   : > { %587 = vperm.xlu0 %2387, %v584_v11  }
  0x87   : > { %v2319_v12 = vpop.permute.xlu1 %2318  ;;  %v2309_v13 = vpop.permute.xlu0 %2308 }
  0x88   : > { %v2311_v14 = vunpack.i.h.bf16 %v2309_v13  ;;  %v2310_v15 = vunpack.i.l.bf16 %v2309_v13  ;;  %v2321_v16 = vunpack.i.h.bf16 %v2319_v12  ;;  %v2320_v17 = vunpack.i.l.bf16 %v2319_v12 }
  0x8a   : > { %v407_v18 = vsel %vm405_vm1, %v2310_v15, %v2311_v14  ;;  %v425_v28 = vsel %vm423_vm2, %v2320_v17, %v2321_v16 }
  0x8b   : > { %v2324_v19 = vpop.permute.xlu1 %2323  ;;  %v2314_v20 = vpop.permute.xlu0 %2313  ;;  %v569_v21 = vpack.c.bf16 %v407_v18, %v387_v2 }
  0x8c   : > { %v2326_v22 = vunpack.i.h.bf16 %v2324_v19  ;;  %v2325_v23 = vunpack.i.l.bf16 %v2324_v19  ;;  %v2316_v24 = vunpack.i.h.bf16 %v2314_v20  ;;  %v2315_v25 = vunpack.i.l.bf16 %v2314_v20 }
  0x8d   : > { %604 = vmatprep.subr.bf16.mxu0 %v569_v21 }
  0x8e   : > { %v406_v26 = vsel %vm405_vm1, %v2315_v25, %v2310_v15  ;;  %v408_v27 = vsel %vm405_vm1, %v2311_v14, %v2316_v24  ;;  %v443_v29 = vsel %vm441_vm3, %v2325_v23, %v2326_v22 }
  0x8f   : > { %v2334_v30 = vpop.permute.xlu1 %2333  ;;  %v2329_v31 = vpop.permute.xlu0 %2328  ;;  %v568_v32 = vpack.c.bf16 %v406_v26, %v2822_v4  ;;  %v570_v33 = vpack.c.bf16 %v408_v27, %v2820_v3  ;;  %v572_v34 = vpack.c.bf16 %v443_v29, %v425_v28 }
  0x90   : > { %v2336_v35 = vunpack.i.h.bf16 %v2334_v30  ;;  %v2335_v36 = vunpack.i.l.bf16 %v2334_v30  ;;  %v2331_v37 = vunpack.i.h.bf16 %v2329_v31  ;;  %v2330_v38 = vunpack.i.l.bf16 %v2329_v31 }
  0x91   : > { %605 = vmatpush1.bf16.msra.mxu0 %v568_v32  ;;  %2253 = vmatpush3.bf16.msra.mxu1 %v570_v33 }
  0x92   : > { %606 = vmatprep.subr.bf16.mxu0 %v572_v34  ;;  %2254 = vmatprep.subr.bf16.mxu1 %v2729_v1  ;;  %v424_v39 = vsel %vm423_vm2, %v2330_v38, %v2320_v17  ;;  %v442_v40 = vsel %vm441_vm3, %v2335_v36, %v2325_v23  ;;  %v426_v41 = vsel %vm423_vm2, %v2321_v16, %v2331_v37 }
  0x93   : > { %v2344_v42 = vpop.permute.xlu1 %2343  ;;  %v2339_v43 = vpop.permute.xlu0 %2338  ;;  %v571_v44 = vpack.c.bf16 %v442_v40, %v424_v39  ;;  %v444_v45 = vsel %vm441_vm3, %v2326_v22, %v2336_v35  ;;  %v583_v39 = vld [vmem:[%s3543_s1] sm:$0xf]  ;;  %v689_v40 = vlaneseq }
  0x94   : > { %v2346_v46 = vunpack.i.h.bf16 %v2344_v42  ;;  %v2345_v47 = vunpack.i.l.bf16 %v2344_v42  ;;  %v2341_v48 = vunpack.i.h.bf16 %v2339_v43  ;;  %v2340_v49 = vunpack.i.l.bf16 %v2339_v43 }
  0x95   : > { %607 = vmatpush1.bf16.msra.mxu0 %v571_v44  ;;  %v573_v50 = vpack.c.bf16 %v444_v45, %v426_v41  ;;  %v2910_v41 = vshrl.u32 %v689_v40, 7  ;;  %v361_v45 = vld [vmem:[%s3551_s9] ss:$8 sm:$0x7] }
  0x96   : > { %v461_v51 = vsel %vm459_vm4, %v2340_v49, %v2341_v48  ;;  %v479_v52 = vsel %vm477_vm5, %v2345_v47, %v2346_v46 }
  0x97   : > { %2255 = vmatpush3.bf16.msra.mxu1 %v573_v50  ;;  %v2354_v53 = vpop.permute.xlu1 %2353  ;;  %v2349_v54 = vpop.permute.xlu0 %2348  ;;  %v575_v55 = vpack.c.bf16 %v479_v52, %v461_v51  ;;  %v2913_v42 = vsub.s32 0, %v2910_v41  ;;  %v2916_v43 = vsub.s32 2, %v2910_v41 }
  0x98   : > { %v2356_v56 = vunpack.i.h.bf16 %v2354_v53  ;;  %v2355_v57 = vunpack.i.l.bf16 %v2354_v53  ;;  %v2351_v58 = vunpack.i.h.bf16 %v2349_v54  ;;  %v2350_v59 = vunpack.i.l.bf16 %v2349_v54  ;;  %2256 = vmatprep.subr.bf16.mxu1 %v2729_v1 }
  0x99   : > { %608 = vmatprep.subr.bf16.mxu0 %v575_v55  ;;  %v692_v50 = vrot.slane %v361_v45, %v2913_v42  ;;  %v700_v52 = vrot.slane %v361_v45, %v2916_v43 }
  0x9a   : > { %v460_v60 = vsel %vm459_vm4, %v2350_v59, %v2340_v49  ;;  %v478_v61 = vsel %vm477_vm5, %v2355_v57, %v2345_v47  ;;  %v462_v62 = vsel %vm459_vm4, %v2341_v48, %v2351_v58  ;;  %v480_v63 = vsel %vm477_vm5, %v2346_v46, %v2356_v56 }
  0x9b   : > { %v2364_v0 = vpop.permute.xlu1 %2363  ;;  %v2359_v2 = vpop.permute.xlu0 %2358  ;;  %v574_v3 = vpack.c.bf16 %v478_v61, %v460_v60  ;;  %v576_v4 = vpack.c.bf16 %v480_v63, %v462_v62  ;;  %v2922_v48 = vsub.s32 1, %v2910_v41 }
  0x9c   : > { %v2366_v5 = vunpack.i.h.bf16 %v2364_v0  ;;  %v2365_v6 = vunpack.i.l.bf16 %v2364_v0  ;;  %v2361_v7 = vunpack.i.h.bf16 %v2359_v2  ;;  %v2360_v9 = vunpack.i.l.bf16 %v2359_v2 }
  0x9d   : > { %609 = vmatpush1.bf16.msra.mxu0 %v574_v3  ;;  %2257 = vmatpush3.bf16.msra.mxu1 %v576_v4  ;;  %v696_v2 = vrot.slane %v361_v45, %v2922_v48 }
  0x9e   : > { %v497_v10 = vsel %vm495_vm6, %v2360_v9, %v2361_v7  ;;  %v515_v11 = vsel %vm513_vm7, %v2365_v6, %v2366_v5  ;;  %2258 = vmatprep.subr.bf16.mxu1 %v2729_v1 }
  0x9f   : > { %v2374_v12 = vpop.permute.xlu1 %2373  ;;  %v2369_v13 = vpop.permute.xlu0 %2368  ;;  %v578_v14 = vpack.c.bf16 %v515_v11, %v497_v10 }
  0xa0   : > { %v2376_v15 = vunpack.i.h.bf16 %v2374_v12  ;;  %v2375_v16 = vunpack.i.l.bf16 %v2374_v12  ;;  %v2371_v17 = vunpack.i.h.bf16 %v2369_v13  ;;  %v2370_v18 = vunpack.i.l.bf16 %v2369_v13 }
  0xa1   : > { %610 = vmatprep.subr.bf16.mxu0 %v578_v14 }
  0xa2   : > { %v496_v19 = vsel %vm495_vm6, %v2370_v18, %v2360_v9  ;;  %v514_v20 = vsel %vm513_vm7, %v2375_v16, %v2365_v6  ;;  %v498_v21 = vsel %vm495_vm6, %v2361_v7, %v2371_v17  ;;  %v516_v22 = vsel %vm513_vm7, %v2366_v5, %v2376_v15 }
  0xa3   : > { %v2384_v23 = vpop.permute.xlu1 %2383  ;;  %v2379_v24 = vpop.permute.xlu0 %2378  ;;  %v577_v25 = vpack.c.bf16 %v514_v20, %v496_v19  ;;  %v579_v26 = vpack.c.bf16 %v516_v22, %v498_v21 }
  0xa4   : > { %v2386_v27 = vunpack.i.h.bf16 %v2384_v23  ;;  %v2385_v28 = vunpack.i.l.bf16 %v2384_v23  ;;  %v2381_v29 = vunpack.i.h.bf16 %v2379_v24  ;;  %v2380_v30 = vunpack.i.l.bf16 %v2379_v24 }
  0xa5   : > { %611 = vmatpush1.bf16.msra.mxu0 %v577_v25  ;;  %2259 = vmatpush3.bf16.msra.mxu1 %v579_v26 }
  0xa6   : > { %v533_v31 = vsel %vm531_vm8, %v2381_v29, %v2385_v28  ;;  %2260 = vmatprep.subr.bf16.mxu1 %v2729_v1  ;;  %v532_v32 = vsel %vm531_vm8, %v2380_v30, %v2381_v29  ;;  %v534_v33 = vsel %vm531_vm8, %v2385_v28, %v2386_v27 }
  0xa7   : > { %v581_v34 = vpack.c.bf16 %v533_v31, %v533_v31  ;;  %v580_v35 = vpack.c.bf16 %v532_v32, %v532_v32  ;;  %v582_v36 = vpack.c.bf16 %v534_v33, %v534_v33 }
  0xa9   : > { %2225 = vmatprep.subr.msk.bf16.mxu0 %vm594_vm9, %v581_v34  ;;  %v596_v37 = vsel %vm594_vm9, %v580_v35, 0  ;;  %v602_v38 = vsel %vm594_vm9, %v582_v36, 0 }
  0xaa   : > { %613 = vmatpush1.bf16.msra.mxu0 %v596_v37  ;;  %2261 = vmatpush3.bf16.msra.mxu1 %v602_v38 }
  0xab   : > { %2266 = vmatprep.subr.bf16.mxu1 %v2729_v1 }
  0xad   : > { %2226 = vmatmul.mubr.msk.bf16.vlgmr.msra.gmra.mrb[0].mxu0 %vm590_vm10, %v583_v39  ;;  %2263 = vmatmul.mubr.msk.bf16.vlgmr.msra.gmra.mrb[0].mxu1 %vm590_vm10, %v583_v39 }
  0xae   : > { %1058 = vmatprep.mubr.bf16.mxu0 %v2737_v8  ;;  %2276 = vmatprep.mubr.msk.bf16.mxu1 %vm2738_vm0, %v2729_v1  ;;  %vm796_vm0 = vcmask 1047856  }
  0xb4   : > { %v588_v44 = vpop.permute.xlu0 %587 }
 0x180   : > { %v638_v46 = vpop.f32.mrb[0].mxu0  ;;  %v679_v47 = vpop.f32.mrb[0].mxu1 }
 0x181   : > { %v639_v49 = vadd.f32 %v638_v46, %v588_v44  ;;  %v680_v51 = vadd.f32 %v679_v47, %v588_v44  ;;  %v640_v53 = vpop.f32.mrb[1].mxu0  ;;  %v2264_v54 = vpop.f32.mrb[1].mxu1 }
 0x182   : > { %v641_v55 = vadd.f32 %v640_v53, %v588_v44  ;;  %v642_v56 = vpop.f32.mrb[2].mxu0  ;;  %v682_v57 = vpop.f32.mrb[2].mxu1  ;;  %v997_v53 = vld [vmem:[%s3546_s4] sm:$0xff] }
 0x183   : > { %v685_v58 = vmax.f32 %v639_v49, 0.0  ;;  %v687_v59 = vmax.f32 %v680_v51, 0.0  ;;  %v643_v60 = vpop.f32.mrb[3].mxu0  ;;  %v2265_v61 = vpop.f32.mrb[3].mxu1 }
 0x184   : > { %v686_v0 = vmax.f32 %v641_v55, 0.0 }
 0x185   : > { %v704_v62 = vmul.f32 %v692_v50, %v685_v58  ;;  %v706_v63 = vmul.f32 %v700_v52, %v687_v59  ;;  %v998_v52 = vld [vmem:[%s3546_s4 + $0x8] sm:$0xff] }
 0x186   : > { %v705_v3 = vmul.f32 %v696_v2, %v686_v0 }
 0x187   : > { %714 = vrot.lane.b32.xlu0 %v706_v63, %s2740_s14  ;;  %710 = vrot.lane.b32.xlu1 %v704_v62, %s2740_s14 }
 0x18b   : > { %712 = vrot.lane.b32.xlu1 %v705_v3, %s2740_s14 }
 0x1f9   : > { %v715_v4 = vpop.permute.xlu0 %714  ;;  %v711_v5 = vpop.permute.xlu1 %710 }
 0x1fa   : > { %726 = vst.msk [vmem:[#allocation2 + $0x58] sm:$0xff] %vm370_vm11, %v715_v4 }
 0x1fb   : > { %723 = vst.msk [vmem:[#allocation2 + $0x40] sm:$0xff] %vm722_vm13, %v711_v5 }
 0x1fd   : > { %v713_v6 = vpop.permute.xlu1 %712 }
 0x1fe   : > { %v2933_v7 = vsel %vm370_vm11, %v711_v5, %v713_v6  ;;  %v2936_v9 = vsel %vm370_vm11, %v713_v6, %v715_v4 }
 0x1ff   : > { %725 = vst [vmem:[#allocation2 + $0x50] sm:$0xff] %v2936_v9  ;;  %737 = vrot.lane.b32.xlu0 %v2933_v7, %s2731_s21 }
 0x201   : > { %v2943_v11 = vld [vmem:[#allocation2 + $0x58] sm:$0xff] }
 0x202   : > { %v2941_v10 = vld [vmem:[#allocation2 + $0x40] sm:$0xff] }
 0x203   : > { %735 = vrot.lane.b32.xlu1 %v2941_v10, %s2731_s21  ;;  %741 = vrot.lane.b32.xlu0 %v2943_v11, %s2731_s21 }
 0x207   : > { %739 = vrot.lane.b32.xlu1 %v2936_v9, %s2731_s21 }
 0x271   : > { %v738_v12 = vpop.permute.xlu0 %737 }
 0x275   : > { %v736_v13 = vpop.permute.xlu1 %735  ;;  %v742_v17 = vpop.permute.xlu0 %741 }
 0x276   : > { %v743_v14 = vsel %vm405_vm1, %v736_v13, %v738_v12  ;;  %v753_v22 = vmax.f32 %v2943_v11, %v742_v17 }
 0x277   : > { %v750_v15 = vmax.f32 %v2941_v10, %v743_v14 }
 0x279   : > { %v740_v16 = vpop.permute.xlu1 %739  ;;  %758 = vrot.lane.b32.xlu1 %v750_v15, %s2732_s22 }
 0x27a   : > { %v744_v18 = vsel %vm405_vm1, %v738_v12, %v740_v16  ;;  %v745_v19 = vsel %vm405_vm1, %v740_v16, %v742_v17 }
 0x27b   : > { %v751_v20 = vmax.f32 %v2933_v7, %v744_v18  ;;  %v752_v21 = vmax.f32 %v2936_v9, %v745_v19 }
 0x27d   : > { %760 = vrot.lane.b32.xlu0 %v751_v20, %s2732_s22  ;;  %762 = vrot.lane.b32.xlu1 %v752_v21, %s2732_s22 }
 0x281   : > { %764 = vrot.lane.b32.xlu0 %v753_v22, %s2732_s22 }
 0x2eb   : > { %v759_v23 = vpop.permute.xlu1 %758 }
 0x2ef   : > { %v761_v24 = vpop.permute.xlu0 %760  ;;  %v763_v25 = vpop.permute.xlu1 %762 }
 0x2f0   : > { %v766_v26 = vsel %vm441_vm3, %v759_v23, %v761_v24  ;;  %v767_v27 = vsel %vm441_vm3, %v761_v24, %v763_v25 }
 0x2f1   : > { %v773_v28 = vmax.f32 %v750_v15, %v766_v26  ;;  %v774_v29 = vmax.f32 %v751_v20, %v767_v27 }
 0x2f3   : > { %v765_v30 = vpop.permute.xlu0 %764  ;;  %781 = vrot.lane.b32.xlu1 %v773_v28, %s2740_s14  ;;  %783 = vrot.lane.b32.xlu0 %v774_v29, %s2740_s14 }
 0x2f4   : > { %v776_v31 = vmax.f32 %v753_v22, %v765_v30  ;;  %v768_v32 = vsel %vm441_vm3, %v763_v25, %v765_v30 }
 0x2f5   : > { %v775_v33 = vmax.f32 %v752_v21, %v768_v32 }
 0x2f7   : > { %785 = vrot.lane.b32.xlu1 %v775_v33, %s2740_s14  ;;  %787 = vrot.lane.b32.xlu0 %v776_v31, %s2740_s14 }
 0x365   : > { %v782_v34 = vpop.permute.xlu1 %781  ;;  %v784_v35 = vpop.permute.xlu0 %783 }
 0x366   : > { %797 = vst.msk [vmem:[#allocation3] sm:$0xff] %vm796_vm0, %v782_v34  ;;  %v789_v36 = vsel %vm370_vm11, %v782_v34, %v784_v35  ;;  %vm925_vm0 = vcmask 441344  }
 0x369   : > { %v786_v37 = vpop.permute.xlu1 %785  ;;  %v788_v38 = vpop.permute.xlu0 %787 }
 0x36a   : > { %v790_v39 = vsel %vm370_vm11, %v784_v35, %v786_v37  ;;  %v791_v44 = vsel %vm370_vm11, %v786_v37, %v788_v38 }
 0x36b   : > { %800 = vst.msk [vmem:[#allocation3 + $0x18] sm:$0xff] %vm378_vm14, %v791_v44  ;;  %v2388_v45 = vpack.i.bf16 %v790_v39, %v789_v36  ;;  %vm889_vm14 = vcmask 719872  }
 0x36d   : > { %2389 = vrot.lane.b32.xlu1 %v2388_v45, %s2730_s20  ;;  %v801_v46 = vld [vmem:[#allocation3] sm:$0xff] }
 0x36e   : > { %v2458_v50 = vpack.i.bf16 %v789_v36, %v801_v46 }
 0x371   : > { %2399 = vrot.lane.b32.xlu1 %v2388_v45, %s2741_s8 }
 0x372   : > { %v804_v47 = vld [vmem:[#allocation3 + $0x18] sm:$0xff] }
 0x373   : > { %v2393_v49 = vpack.i.bf16 %v804_v47, %v801_v46  ;;  %v2463_v51 = vpack.i.bf16 %v804_v47, %v790_v39 }
 0x375   : > { %2394 = vrot.lane.b32.xlu0 %v2393_v49, %s2730_s20  ;;  %2409 = vrot.lane.b32.xlu1 %v2393_v49, %s2741_s8 }
 0x379   : > { %2404 = vrot.lane.b32.xlu0 %v2388_v45, %s2736_s26  ;;  %2419 = vrot.lane.b32.xlu1 %v2388_v45, %s2739_s27 }
 0x37d   : > { %2414 = vrot.lane.b32.xlu0 %v2393_v49, %s2736_s26  ;;  %2429 = vrot.lane.b32.xlu1 %v2393_v49, %s2739_s27 }
 0x381   : > { %2424 = vrot.lane.b32.xlu0 %v2388_v45, %s2742_s17  ;;  %2439 = vrot.lane.b32.xlu1 %v2388_v45, %s2743_s18 }
 0x385   : > { %2434 = vrot.lane.b32.xlu0 %v2393_v49, %s2742_s17  ;;  %2449 = vrot.lane.b32.xlu1 %v2393_v49, %s2743_s18 }
 0x389   : > { %2444 = vrot.lane.b32.xlu0 %v2388_v45, %s2744_s19  ;;  %2459 = vrot.lane.b32.xlu1 %v2458_v50, %s2745_s28 }
 0x38d   : > { %2454 = vrot.lane.b32.xlu0 %v2393_v49, %s2744_s19  ;;  %1001 = vperm.xlu1 %2468, %v997_v53  }
 0x391   : > { %2464 = vrot.lane.b32.xlu0 %v2463_v51, %s2745_s28 }
 0x395   : > { %1006 = vperm.xlu0 %2387, %v998_v52  }
 0x3df   : > { %v2390_v54 = vpop.permute.xlu1 %2389 }
 0x3e0   : > { %v2392_v55 = vunpack.i.h.bf16 %v2390_v54  ;;  %v2391_v56 = vunpack.i.l.bf16 %v2390_v54 }
 0x3e2   : > { %v821_v57 = vsel %vm423_vm2, %v2391_v56, %v2392_v55 }
 0x3e3   : > { %v2400_v58 = vpop.permute.xlu1 %2399  ;;  %v981_v59 = vpack.c.bf16 %v821_v57, %v789_v36 }
 0x3e4   : > { %v2402_v3 = vunpack.i.h.bf16 %v2400_v58  ;;  %v2401_v4 = vunpack.i.l.bf16 %v2400_v58 }
 0x3e5   : > { %1026 = vmatprep.subr.bf16.mxu0 %v981_v59 }
 0x3e6   : > { %v839_v18 = vsel %vm837_vm12, %v2401_v4, %v2402_v3 }
 0x3e7   : > { %v2395_v60 = vpop.permute.xlu0 %2394  ;;  %v2410_v61 = vpop.permute.xlu1 %2409 }
 0x3e8   : > { %v2397_v62 = vunpack.i.h.bf16 %v2395_v60  ;;  %v2396_v63 = vunpack.i.l.bf16 %v2395_v60  ;;  %v2412_v16 = vunpack.i.h.bf16 %v2410_v61  ;;  %v2411_v17 = vunpack.i.l.bf16 %v2410_v61 }
 0x3ea   : > { %v820_v0 = vsel %vm423_vm2, %v2396_v63, %v2391_v56  ;;  %v822_v2 = vsel %vm423_vm2, %v2392_v55, %v2397_v62  ;;  %v838_v25 = vsel %vm837_vm12, %v2411_v17, %v2401_v4  ;;  %v840_v26 = vsel %vm837_vm12, %v2402_v3, %v2412_v16 }
 0x3eb   : > { %v2405_v5 = vpop.permute.xlu0 %2404  ;;  %v980_v6 = vpack.c.bf16 %v820_v0, %v801_v46  ;;  %v982_v12 = vpack.c.bf16 %v822_v2, %v790_v39  ;;  %v2420_v13 = vpop.permute.xlu1 %2419  ;;  %vm943_vm12 = vcmask 424960  }
 0x3ec   : > { %v2407_v14 = vunpack.i.h.bf16 %v2405_v5  ;;  %v2406_v15 = vunpack.i.l.bf16 %v2405_v5  ;;  %v2422_v29 = vunpack.i.h.bf16 %v2420_v13  ;;  %v2421_v30 = vunpack.i.l.bf16 %v2420_v13 }
 0x3ed   : > { %1027 = vmatpush1.bf16.msra.mxu0 %v980_v6  ;;  %2267 = vmatpush3.bf16.msra.mxu1 %v982_v12 }
 0x3ee   : > { %v856_v19 = vsel %vm495_vm6, %v2406_v15, %v2407_v14  ;;  %2268 = vmatprep.subr.bf16.mxu1 %v2729_v1  ;;  %v873_v39 = vsel %vm531_vm8, %v2421_v30, %v2422_v29 }
 0x3ef   : > { %v2415_v20 = vpop.permute.xlu0 %2414  ;;  %v984_v21 = vpack.c.bf16 %v856_v19, %v839_v18  ;;  %v2430_v22 = vpop.permute.xlu1 %2429 }
 0x3f0   : > { %v2417_v23 = vunpack.i.h.bf16 %v2415_v20  ;;  %v2416_v24 = vunpack.i.l.bf16 %v2415_v20  ;;  %v2432_v37 = vunpack.i.h.bf16 %v2430_v22  ;;  %v2431_v38 = vunpack.i.l.bf16 %v2430_v22 }
 0x3f1   : > { %1028 = vmatprep.subr.bf16.mxu0 %v984_v21 }
 0x3f2   : > { %v855_v27 = vsel %vm495_vm6, %v2416_v24, %v2406_v15  ;;  %v857_v28 = vsel %vm495_vm6, %v2407_v14, %v2417_v23  ;;  %v872_v53 = vsel %vm531_vm8, %v2431_v38, %v2421_v30  ;;  %v874_v54 = vsel %vm531_vm8, %v2422_v29, %v2432_v37 }
 0x3f3   : > { %v2425_v31 = vpop.permute.xlu0 %2424  ;;  %v983_v32 = vpack.c.bf16 %v855_v27, %v838_v25  ;;  %v985_v33 = vpack.c.bf16 %v857_v28, %v840_v26  ;;  %v2440_v34 = vpop.permute.xlu1 %2439 }
 0x3f4   : > { %v2427_v35 = vunpack.i.h.bf16 %v2425_v31  ;;  %v2426_v36 = vunpack.i.l.bf16 %v2425_v31  ;;  %v2442_v51 = vunpack.i.h.bf16 %v2440_v34  ;;  %v2441_v52 = vunpack.i.l.bf16 %v2440_v34 }
 0x3f5   : > { %1029 = vmatpush1.bf16.msra.mxu0 %v983_v32  ;;  %2269 = vmatpush3.bf16.msra.mxu1 %v985_v33  ;;  %v2704_v32 = vld [vmem:[%s3545_s3] sm:$0xff]  }
 0x3f6   : > { %v891_v44 = vsel %vm889_vm14, %v2426_v36, %v2427_v35  ;;  %2270 = vmatprep.subr.bf16.mxu1 %v2729_v1  ;;  %v909_v0 = vsel %vm907_vm15, %v2441_v52, %v2442_v51 }
 0x3f7   : > { %v2435_v45 = vpop.permute.xlu0 %2434  ;;  %v987_v46 = vpack.c.bf16 %v891_v44, %v873_v39  ;;  %v2450_v47 = vpop.permute.xlu1 %2449 }
 0x3f8   : > { %v2437_v49 = vunpack.i.h.bf16 %v2435_v45  ;;  %v2436_v50 = vunpack.i.l.bf16 %v2435_v45  ;;  %v2451_v63 = vunpack.i.l.bf16 %v2450_v47  ;;  %v2452_v2 = vunpack.i.h.bf16 %v2450_v47 }
 0x3f9   : > { %1030 = vmatprep.subr.bf16.mxu0 %v987_v46 }
 0x3fa   : > { %v890_v55 = vsel %vm889_vm14, %v2436_v50, %v2426_v36  ;;  %v892_v56 = vsel %vm889_vm14, %v2427_v35, %v2437_v49  ;;  %v908_v15 = vsel %vm907_vm15, %v2451_v63, %v2441_v52  ;;  %v910_v16 = vsel %vm907_vm15, %v2442_v51, %v2452_v2 }
 0x3fb   : > { %v986_v57 = vpack.c.bf16 %v890_v55, %v872_v53  ;;  %v988_v58 = vpack.c.bf16 %v892_v56, %v874_v54  ;;  %v2445_v59 = vpop.permute.xlu0 %2444  ;;  %v2460_v60 = vpop.permute.xlu1 %2459 }
 0x3fc   : > { %v2447_v61 = vunpack.i.h.bf16 %v2445_v59  ;;  %v2446_v62 = vunpack.i.l.bf16 %v2445_v59  ;;  %v2462_v3 = vunpack.i.h.bf16 %v2460_v60  ;;  %v2461_v4 = vunpack.i.l.bf16 %v2460_v60 }
 0x3fd   : > { %1031 = vmatpush1.bf16.msra.mxu0 %v986_v57  ;;  %2271 = vmatpush3.bf16.msra.mxu1 %v988_v58 }
 0x3fe   : > { %v927_v5 = vsel %vm925_vm0, %v2446_v62, %v2447_v61  ;;  %2272 = vmatprep.subr.bf16.mxu1 %v2729_v1  ;;  %v944_v19 = vsel %vm943_vm12, %v2461_v4, %v2462_v3 }
 0x3ff   : > { %v2455_v6 = vpop.permute.xlu0 %2454  ;;  %v990_v12 = vpack.c.bf16 %v927_v5, %v909_v0  ;;  %v992_v25 = vpack.c.bf16 %v944_v19, %v944_v19 }
 0x400   : > { %v2457_v13 = vunpack.i.h.bf16 %v2455_v6  ;;  %v2456_v14 = vunpack.i.l.bf16 %v2455_v6 }
 0x401   : > { %1032 = vmatprep.subr.bf16.mxu0 %v990_v12  ;;  %v1018_v30 = vsel %vm594_vm9, %v992_v25, 0 }
 0x402   : > { %v926_v17 = vsel %vm925_vm0, %v2456_v14, %v2446_v62  ;;  %v928_v18 = vsel %vm925_vm0, %v2447_v61, %v2457_v13 }
 0x403   : > { %v989_v20 = vpack.c.bf16 %v926_v17, %v908_v15  ;;  %v991_v21 = vpack.c.bf16 %v928_v18, %v910_v16  ;;  %v2465_v22 = vpop.permute.xlu0 %2464 }
 0x404   : > { %v2467_v23 = vunpack.i.h.bf16 %v2465_v22  ;;  %v2466_v24 = vunpack.i.l.bf16 %v2465_v22 }
 0x405   : > { %1033 = vmatpush1.bf16.msra.mxu0 %v989_v20  ;;  %2273 = vmatpush3.bf16.msra.mxu1 %v991_v21 }
 0x406   : > { %v945_v26 = vsel %vm943_vm12, %v2462_v3, %v2466_v24  ;;  %2274 = vmatprep.subr.bf16.mxu1 %v2729_v1  ;;  %v946_v27 = vsel %vm943_vm12, %v2466_v24, %v2467_v23  ;;  %v2221_v24 = vld [vmem:[%s3551_s9 + $0x1] ss:$8 sm:$0x7] }
 0x407   : > { %v993_v28 = vpack.c.bf16 %v945_v26, %v945_v26  ;;  %v994_v29 = vpack.c.bf16 %v946_v27, %v946_v27  ;;  %v2222_v26 = vld [vmem:[%s3551_s9 + $0x2] ss:$8 sm:$0x7] }
 0x409   : > { %2229 = vmatprep.subr.msk.bf16.mxu0 %vm594_vm9, %v993_v28  ;;  %v1024_v31 = vsel %vm594_vm9, %v994_v29, 0  ;;  %v2223_v28 = vld [vmem:[%s3551_s9 + $0x3] ss:$8 sm:$0x7]  ;;  %v1224_v29 = vrot.slane %v2222_v26, %v2913_v42 }
 0x40a   : > { %1035 = vmatpush1.bf16.msra.mxu0 %v1018_v30  ;;  %2275 = vmatpush3.bf16.msra.mxu1 %v1024_v31  ;;  %v3108_v30 = vrot.slane %v2222_v26, %v2922_v48  ;;  %v3111_v31 = vrot.slane %v2221_v24, %v2916_v43 }
 0x40b   : > { %2028 = vmatprep.subr.bf16.mxu1 %v2737_v8 }
 0x40c   : > { %v1002_v1 = vpop.permute.xlu1 %1001 }
 0x40d   : > { %2230 = vmatmul.mubr.msk.bf16.vlgmr.msra.gmra.mrb[4].mxu0 %vm590_vm10, %v2704_v32  ;;  %2277 = vmatmul.mubr.msk.bf16.vlgmr.msra.gmra.mrb[4].mxu1 %vm590_vm10, %v2704_v32  ;;  %v1166_v32 = vrot.slane %v2221_v24, %v2913_v42 }
 0x414   : > { %v1007_v33 = vpop.permute.xlu0 %1006 }
 0x4e0   : > { %v1060_v34 = vpop.f32.mrb[4].mxu0  ;;  %v1103_v35 = vpop.f32.mrb[4].mxu1 }
 0x4e1   : > { %v1104_v36 = vadd.f32 %v1103_v35, %v1002_v1  ;;  %v1062_v37 = vpop.f32.mrb[5].mxu0  ;;  %v2278_v38 = vpop.f32.mrb[5].mxu1  ;;  %v1061_v46 = vadd.f32 %v1060_v34, %v1002_v1 }
 0x4e2   : > { %v1063_v39 = vadd.f32 %v1062_v37, %v1002_v1  ;;  %v1064_v44 = vpop.f32.mrb[6].mxu0  ;;  %v1106_v45 = vpop.f32.mrb[6].mxu1  ;;  %v3115_v1 = vrot.slane %v2221_v24, %v2922_v48  ;;  %v1280_v38 = vrot.slane %v2223_v28, %v2913_v42 }
 0x4e3   : > { %v1112_v47 = vmax.f32 %v1104_v36, 0.0  ;;  %v1066_v49 = vpop.f32.mrb[7].mxu0  ;;  %v2279_v50 = vpop.f32.mrb[7].mxu1  ;;  %v1065_v52 = vadd.f32 %v1064_v44, %v1007_v33  ;;  %v1110_v53 = vmax.f32 %v1061_v46, 0.0  ;;  %v1107_v56 = vadd.f32 %v1106_v45, %v1007_v33 }
 0x4e4   : > { %v1111_v51 = vmax.f32 %v1063_v39, 0.0  ;;  %v1067_v54 = vadd.f32 %v1066_v49, %v1007_v33  ;;  %v3118_v33 = vrot.slane %v2222_v26, %v2916_v43  ;;  %v3122_v36 = vrot.slane %v2223_v28, %v2916_v43 }
 0x4e5   : > { %1126 = vrot.lane.b32.xlu1 %v1112_v47, %s2740_s14  ;;  %v1113_v55 = vmax.f32 %v1065_v52, 0.0  ;;  %v1115_v58 = vmax.f32 %v1107_v56, 0.0  ;;  %v3126_v39 = vrot.slane %v2223_v28, %v2922_v48 }
 0x4e6   : > { %1124 = vrot.lane.b32.xlu0 %v1111_v51, %s2740_s14  ;;  %v1114_v57 = vmax.f32 %v1067_v54, 0.0 }
 0x4e9   : > { %1122 = vrot.lane.b32.xlu1 %v1110_v53, %s2740_s14  ;;  %v2224_v53 = vld [vmem:[%s3551_s9 + $0x4] ss:$8 sm:$0x7] }
 0x4ea   : > { %1128 = vrot.lane.b32.xlu0 %v1113_v55, %s2740_s14  ;;  %v3139_v54 = vrot.slane %v2224_v53, %v2922_v48 }
 0x4ed   : > { %1130 = vrot.lane.b32.xlu1 %v1114_v57, %s2740_s14 }
 0x4ee   : > { %1132 = vrot.lane.b32.xlu0 %v1115_v58, %s2740_s14 }
 0x557   : > { %v1127_v59 = vpop.permute.xlu1 %1126 }
 0x558   : > { %1149 = vst.msk [vmem:[#allocation4 + $0x18] sm:$0xff] %vm370_vm11, %v1127_v59  ;;  %v1125_v60 = vpop.permute.xlu0 %1124 }
 0x559   : > { %v3033_v61 = vsel %vm370_vm11, %v1125_v60, %v1127_v59 }
 0x55b   : > { %v1123_v62 = vpop.permute.xlu1 %1122 }
 0x55c   : > { %v3036_v63 = vsel %vm370_vm11, %v1123_v62, %v1125_v60  ;;  %1146 = vst.msk [vmem:[#allocation4] sm:$0xff] %vm722_vm13, %v1123_v62  ;;  %v1129_v0 = vpop.permute.xlu0 %1128  ;;  %v1336_v60 = vrot.slane %v2224_v53, %v2913_v42 }
 0x55d   : > { %1150 = vst.msk [vmem:[#allocation4 + $0x20] sm:$0xff] %vm722_vm13, %v1129_v0 }
 0x55f   : > { %v1131_v2 = vpop.permute.xlu1 %1130  ;;  %v1157_v3 = vld [vmem:[#allocation4 + $0x18] sm:$0xff] }
 0x560   : > { %v3041_v4 = vsel %vm370_vm11, %v1129_v0, %v1131_v2  ;;  %1192 = vrot.lane.b32.xlu0 %v1157_v3, %s2734_s24  ;;  %v1133_v5 = vpop.permute.xlu0 %1132 }
 0x561   : > { %v3045_v6 = vsel %vm370_vm11, %v1131_v2, %v1133_v5  ;;  %1153 = vst.msk [vmem:[#allocation4 + $0x38] sm:$0xff] %vm370_vm11, %v1133_v5 }
 0x563   : > { %v3048_v12 = vld [vmem:[#allocation4] sm:$0xff] }
 0x564   : > { %1242 = vrot.lane.b32.xlu0 %v1157_v3, %s2732_s22  ;;  %1186 = vrot.lane.b32.xlu1 %v3048_v12, %s2734_s24  ;;  %v3070_v14 = vld [vmem:[#allocation4 + $0x20] sm:$0xff]  ;;  %v1348_v26 = vmul.f32 %v1336_v60, %v3048_v12 }
 0x568   : > { %1298 = vrot.lane.b32.xlu0 %v1157_v3, %s2731_s21  ;;  %1236 = vrot.lane.b32.xlu1 %v3048_v12, %s2732_s22  ;;  %v1161_v13 = vld [vmem:[#allocation4 + $0x38] sm:$0xff] }
 0x56c   : > { %1200 = vrot.lane.b32.xlu0 %v1161_v13, %s2734_s24  ;;  %1292 = vrot.lane.b32.xlu1 %v3048_v12, %s2731_s21 }
 0x570   : > { %1250 = vrot.lane.b32.xlu0 %v1161_v13, %s2732_s22  ;;  %1190 = vrot.lane.b32.xlu1 %v3033_v61, %s2734_s24 }
 0x574   : > { %1240 = vrot.lane.b32.xlu1 %v3033_v61, %s2732_s22  ;;  %1188 = vrot.lane.b32.xlu0 %v3036_v63, %s2734_s24 }
 0x578   : > { %1296 = vrot.lane.b32.xlu1 %v3033_v61, %s2731_s21  ;;  %1238 = vrot.lane.b32.xlu0 %v3036_v63, %s2732_s22 }
 0x57c   : > { %1194 = vrot.lane.b32.xlu1 %v3070_v14, %s2734_s24  ;;  %1294 = vrot.lane.b32.xlu0 %v3036_v63, %s2731_s21 }
 0x580   : > { %1244 = vrot.lane.b32.xlu1 %v3070_v14, %s2732_s22  ;;  %1196 = vrot.lane.b32.xlu0 %v3041_v4, %s2734_s24 }
 0x584   : > { %1300 = vrot.lane.b32.xlu1 %v3070_v14, %s2731_s21  ;;  %1246 = vrot.lane.b32.xlu0 %v3041_v4, %s2732_s22 }
 0x588   : > { %1198 = vrot.lane.b32.xlu1 %v3045_v6, %s2734_s24  ;;  %1302 = vrot.lane.b32.xlu0 %v3041_v4, %s2731_s21 }
 0x58c   : > { %1248 = vrot.lane.b32.xlu1 %v3045_v6, %s2732_s22  ;;  %1306 = vrot.lane.b32.xlu0 %v1161_v13, %s2731_s21 }
 0x590   : > { %1304 = vrot.lane.b32.xlu1 %v3045_v6, %s2731_s21 }
 0x5d2   : > { %v1193_v15 = vpop.permute.xlu0 %1192 }
 0x5d6   : > { %v1243_v16 = vpop.permute.xlu0 %1242  ;;  %v1187_v17 = vpop.permute.xlu1 %1186 }
 0x5da   : > { %v1299_v18 = vpop.permute.xlu0 %1298  ;;  %v1237_v19 = vpop.permute.xlu1 %1236 }
 0x5de   : > { %v3093_v20 = vpop.permute.xlu0 %1200  ;;  %v1293_v21 = vpop.permute.xlu1 %1292 }
 0x5e2   : > { %v3095_v22 = vpop.permute.xlu0 %1250  ;;  %v1191_v23 = vpop.permute.xlu1 %1190 }
 0x5e3   : > { %v1204_v49 = vsel %vm459_vm4, %v1191_v23, %v1193_v15 }
 0x5e4   : > { %v1216_v62 = vmul.f32 %v1204_v49, %v3111_v31 }
 0x5e6   : > { %v1189_v25 = vpop.permute.xlu0 %1188  ;;  %v1241_v27 = vpop.permute.xlu1 %1240 }
 0x5e7   : > { %v1202_v34 = vsel %vm459_vm4, %v1187_v17, %v1189_v25  ;;  %v1203_v44 = vsel %vm459_vm4, %v1189_v25, %v1191_v23  ;;  %v1254_v45 = vsel %vm441_vm3, %v1241_v27, %v1243_v16  ;;  %v1349_v16 = vmul.f32 %v3139_v54, %v3036_v63 }
 0x5e8   : > { %v1214_v55 = vmul.f32 %v1202_v34, %v1166_v32  ;;  %v1215_v56 = vmul.f32 %v1203_v44, %v3115_v1  ;;  %v1266_v57 = vmul.f32 %v1254_v45, %v3118_v33  ;;  %v1344_v17 = vrot.slane %v2224_v53, %v2916_v43 }
 0x5ea   : > { %v1239_v35 = vpop.permute.xlu0 %1238  ;;  %v1297_v37 = vpop.permute.xlu1 %1296  ;;  %v1350_v63 = vmul.f32 %v1344_v17, %v3033_v61 }
 0x5eb   : > { %v1252_v46 = vsel %vm441_vm3, %v1237_v19, %v1239_v35  ;;  %v1253_v47 = vsel %vm441_vm3, %v1239_v35, %v1241_v27  ;;  %v1310_v52 = vsel %vm405_vm1, %v1297_v37, %v1299_v18  ;;  %v1272_v18 = vadd.f32 %v1266_v57, %v1216_v62 }
 0x5ec   : > { %v1264_v50 = vmul.f32 %v1252_v46, %v1224_v29  ;;  %v1265_v51 = vmul.f32 %v1253_v47, %v3108_v30  ;;  %v1322_v0 = vmul.f32 %v1310_v52, %v3122_v36 }
 0x5ee   : > { %v1295_v58 = vpop.permute.xlu0 %1294  ;;  %v1195_v59 = vpop.permute.xlu1 %1194  ;;  %v1270_v5 = vadd.f32 %v1264_v50, %v1214_v55  ;;  %v1271_v48 = vadd.f32 %v1265_v51, %v1215_v56  ;;  %v1351_v55 = vmul.f32 %v1336_v60, %v3070_v14 }
 0x5ef   : > { %v1308_v2 = vsel %vm405_vm1, %v1293_v21, %v1295_v58  ;;  %v1309_v3 = vsel %vm405_vm1, %v1295_v58, %v1297_v37  ;;  %v1328_v21 = vadd.f32 %v1322_v0, %v1272_v18 }
 0x5f0   : > { %v1320_v13 = vmul.f32 %v1308_v2, %v1280_v38  ;;  %v1321_v15 = vmul.f32 %v1309_v3, %v3126_v39 }
 0x5f1   : > { %v1356_v45 = vadd.f32 %v1350_v63, %v1328_v21 }
 0x5f2   : > { %v1326_v19 = vadd.f32 %v1320_v13, %v1270_v5  ;;  %v1327_v23 = vadd.f32 %v1321_v15, %v1271_v48  ;;  %v1197_v24 = vpop.permute.xlu0 %1196  ;;  %v1245_v25 = vpop.permute.xlu1 %1244  ;;  %v3183_v15 = vpack.i.bf16 %v2936_v9, %v2933_v7 }
 0x5f3   : > { %v1205_v43 = vsel %vm459_vm4, %v1195_v59, %v1197_v24 }
 0x5f4   : > { %v1354_v27 = vadd.f32 %v1348_v26, %v1326_v19  ;;  %v1355_v28 = vadd.f32 %v1349_v16, %v1327_v23  ;;  %v1217_v46 = vmul.f32 %v1205_v43, %v1166_v32 }
 0x5f6   : > { %v1247_v34 = vpop.permute.xlu0 %1246  ;;  %1366 = vrot.lane.b32.xlu1 %v1354_v27, %s2740_s14  ;;  %1368 = vrot.lane.b32.xlu0 %v1355_v28, %s2740_s14  ;;  %v1301_v35 = vpop.permute.xlu1 %1300 }
 0x5f7   : > { %v1255_v37 = vsel %vm441_vm3, %v1245_v25, %v1247_v34 }
 0x5f8   : > { %v1267_v44 = vmul.f32 %v1255_v37, %v1224_v29 }
 0x5fa   : > { %v1303_v47 = vpop.permute.xlu0 %1302  ;;  %1370 = vrot.lane.b32.xlu1 %v1356_v45, %s2740_s14  ;;  %v1199_v12 = vpop.permute.xlu1 %1198  ;;  %v1273_v50 = vadd.f32 %v1267_v44, %v1217_v46 }
 0x5fb   : > { %v1311_v49 = vsel %vm405_vm1, %v1301_v35, %v1303_v47  ;;  %v1206_v61 = vsel %vm459_vm4, %v1197_v24, %v1199_v12  ;;  %v1207_v56 = vsel %vm459_vm4, %v1199_v12, %v3093_v20 }
 0x5fc   : > { %v1323_v51 = vmul.f32 %v1311_v49, %v1280_v38  ;;  %v1218_v38 = vmul.f32 %v1206_v61, %v3115_v1  ;;  %v1219_v62 = vmul.f32 %v1207_v56, %v3111_v31  ;;  %v1353_v1 = vmul.f32 %v1344_v17, %v3045_v6  ;;  %v1963_v56 = vld [vmem:[%s3548_s6] sm:$0xff] }
 0x5fd   : > { %v1352_v31 = vmul.f32 %v3139_v54, %v3041_v4  ;;  %v3191_v6 = vpack.i.bf16 %v2943_v11, %v2941_v10 }
 0x5fe   : > { %v1329_v52 = vadd.f32 %v1323_v51, %v1273_v50  ;;  %v1249_v53 = vpop.permute.xlu1 %1248  ;;  %v1307_v14 = vpop.permute.xlu0 %1306 }
 0x5ff   : > { %v1256_v29 = vsel %vm441_vm3, %v1247_v34, %v1249_v53  ;;  %v1257_v32 = vsel %vm441_vm3, %v1249_v53, %v3095_v22  ;;  %v2694_v53 = vpack.i.bf16 %v2933_v7, %v2941_v10 }
 0x600   : > { %v1268_v57 = vmul.f32 %v1256_v29, %v3108_v30  ;;  %v1269_v58 = vmul.f32 %v1257_v32, %v3118_v33  ;;  %v1357_v59 = vadd.f32 %v1351_v55, %v1329_v52  ;;  %v3272_v55 = vld [vmem:[%s3547_s5] sm:$0xff] }
 0x601   : > { %v2233_v61 = vcombine.high %v3272_v55, %v3272_v55  ;;  %v2098_v29 = vld [vmem:[#allocation6] sm:$0x1] }
 0x602   : > { %1372 = vrot.lane.b32.xlu0 %v1357_v59, %s2740_s14  ;;  %v1305_v60 = vpop.permute.xlu1 %1304  ;;  %v1274_v2 = vadd.f32 %v1268_v57, %v1218_v38  ;;  %v1275_v3 = vadd.f32 %v1269_v58, %v1219_v62 }
 0x603   : > { %v1312_v20 = vsel %vm405_vm1, %v1303_v47, %v1305_v60  ;;  %v1313_v0 = vsel %vm405_vm1, %v1305_v60, %v1307_v14  ;;  %2236 = vmatprep.mubr.msk.bf16.mxu1 %vm889_vm14, %v2233_v61  ;;  %2235 = vmatprep.mubr.msk.bf16.mxu0 %vm889_vm14, %v2233_v61 }
 0x604   : > { %v1324_v22 = vmul.f32 %v1312_v20, %v3126_v39  ;;  %v1325_v30 = vmul.f32 %v1313_v0, %v3122_v36 }
 0x606   : > { %v1330_v33 = vadd.f32 %v1324_v22, %v1274_v2  ;;  %v1331_v5 = vadd.f32 %v1325_v30, %v1275_v3 }
 0x608   : > { %v1359_v48 = vadd.f32 %v1353_v1, %v1331_v5  ;;  %v1358_v13 = vadd.f32 %v1352_v31, %v1330_v33  ;;  %v2719_v33 = vld [vmem:[#allocation2 + $0x50] sm:$0xff]  ;;  %v2720_v1 = vld [vmem:[#allocation2 + $0x40] sm:$0xff] }
 0x60a   : > { %1376 = vrot.lane.b32.xlu0 %v1359_v48, %s2740_s14  ;;  %1374 = vrot.lane.b32.xlu1 %v1358_v13, %s2740_s14 }
 0x60e   : > { %2470 = vrot.lane.b32.xlu0 %v3183_v15, %s2731_s21  ;;  %2475 = vrot.lane.b32.xlu1 %v3183_v15, %s2730_s20 }
 0x612   : > { %2485 = vrot.lane.b32.xlu0 %v3183_v15, %s2732_s22  ;;  %2480 = vrot.lane.b32.xlu1 %v3191_v6, %s2730_s20 }
 0x616   : > { %2500 = vrot.lane.b32.xlu0 %v3183_v15, %s2733_s23  ;;  %2490 = vrot.lane.b32.xlu1 %v3183_v15, %s2734_s24 }
 0x61a   : > { %2495 = vrot.lane.b32.xlu1 %v3191_v6, %s2734_s24 }
 0x668   : > { %v1369_v4 = vpop.permute.xlu0 %1368  ;;  %v1367_v36 = vpop.permute.xlu1 %1366 }
 0x669   : > { %v1378_v39 = vsel %vm370_vm11, %v1367_v36, %v1369_v4  ;;  %1390 = vst.msk [vmem:[#allocation2] sm:$0xff] %vm722_vm13, %v1367_v36 }
 0x66c   : > { %v1371_v54 = vpop.permute.xlu1 %1370 }
 0x66d   : > { %v1379_v16 = vsel %vm370_vm11, %v1369_v4, %v1371_v54  ;;  %1393 = vst.msk [vmem:[#allocation2 + $0x18] sm:$0xff] %vm370_vm11, %v1371_v54 }
 0x66e   : > { %v2519_v17 = vpack.i.bf16 %v1379_v16, %v1378_v39 }
 0x670   : > { %2520 = vrot.lane.b32.xlu1 %v2519_v17, %s2731_s21  ;;  %v1398_v19 = vld [vmem:[#allocation2] sm:$0xff] }
 0x674   : > { %v1373_v18 = vpop.permute.xlu0 %1372  ;;  %v1401_v23 = vld [vmem:[#allocation2 + $0x18] sm:$0xff]  ;;  %2525 = vrot.lane.b32.xlu1 %v2519_v17, %s2730_s20 }
 0x675   : > { %1394 = vst.msk [vmem:[#allocation2 + $0x20] sm:$0xff] %vm722_vm13, %v1373_v18  ;;  %v2504_v24 = vpack.i.bf16 %v1401_v23, %v1398_v19 }
 0x677   : > { %2505 = vrot.lane.b32.xlu0 %v2504_v24, %s2731_s21 }
 0x678   : > { %2535 = vrot.lane.b32.xlu1 %v2519_v17, %s2734_s24 }
 0x67b   : > { %2510 = vrot.lane.b32.xlu0 %v2504_v24, %s2732_s22 }
 0x67c   : > { %v1377_v25 = vpop.permute.xlu0 %1376  ;;  %v1375_v26 = vpop.permute.xlu1 %1374  ;;  %v1402_v21 = vld [vmem:[#allocation2 + $0x20] sm:$0xff] }
 0x67d   : > { %1397 = vst.msk [vmem:[#allocation2 + $0x38] sm:$0xff] %vm370_vm11, %v1377_v25  ;;  %v1380_v27 = vsel %vm370_vm11, %v1373_v18, %v1375_v26  ;;  %v1381_v28 = vsel %vm370_vm11, %v1375_v26, %v1377_v25  ;;  %v2544_v34 = vpack.i.bf16 %v2941_v10, %v1402_v21  ;;  %v1920_v43 = vpack.c.bf16 %v1402_v21, %v1398_v19  ;;  %v2071_v10 = vld [vmem:[%s3549_s7] sm:$0xff] }
 0x67e   : > { %v1921_v35 = vpack.c.bf16 %v1380_v27, %v1378_v39  ;;  %v1922_v63 = vpack.c.bf16 %v1381_v28, %v1379_v16  ;;  %v2554_v44 = vpack.i.bf16 %v1402_v21, %v1398_v19  ;;  %v2594_v52 = vpack.i.bf16 %v1381_v28, %v1380_v27 }
 0x67f   : > { %2515 = vrot.lane.b32.xlu0 %v2504_v24, %s2733_s23  ;;  %2545 = vrot.lane.b32.xlu1 %v2544_v34, %s2731_s21 }
 0x680   : > { %v3219_v37 = vpop.permute.xlu1 %2475  ;;  %1987 = vmatprep.subr.bf16.mxu0 %v1921_v35  ;;  %2029 = vmatpush1.bf16.msra.mxu1 %v1922_v63  ;;  %v2471_v32 = vpop.permute.xlu0 %2470 }
 0x681   : > { %1988 = vmatpush1.bf16.msra.mxu0 %v1920_v43  ;;  %2030 = vmatprep.subr.bf16.mxu1 %v2737_v8  ;;  %v2477_v46 = vunpack.i.l.bf16 %v3219_v37  ;;  %v2473_v19 = vunpack.i.h.bf16 %v2471_v32 }
 0x683   : > { %2530 = vrot.lane.b32.xlu0 %v2519_v17, %s2732_s22  ;;  %2555 = vrot.lane.b32.xlu1 %v2554_v44, %s2730_s20 }
 0x684   : > { %v3224_v45 = vpop.permute.xlu1 %2480  ;;  %v1405_v12 = vld [vmem:[#allocation2 + $0x38] sm:$0xff]  ;;  %v3293_v58 = vpop.permute.xlu0 %2485 }
 0x685   : > { %v2482_v47 = vunpack.i.l.bf16 %v3224_v45  ;;  %v2549_v50 = vpack.i.bf16 %v2943_v11, %v1405_v12  ;;  %v2559_v51 = vpack.i.bf16 %v1405_v12, %v1401_v23  ;;  %v2472_v23 = vunpack.i.l.bf16 %v2471_v32 }
 0x687   : > { %v3231_v49 = vsel %vm423_vm2, %v2482_v47, %v2477_v46  ;;  %2540 = vrot.lane.b32.xlu0 %v2519_v17, %s2733_s23  ;;  %2565 = vrot.lane.b32.xlu1 %v2544_v34, %s2732_s22  ;;  %v1462_v43 = vsel %vm405_vm1, %v2472_v23, %v2473_v19 }
 0x688   : > { %v3295_v14 = vpop.permute.xlu0 %2500 }
 0x68b   : > { %2550 = vrot.lane.b32.xlu0 %v2549_v50, %s2731_s21  ;;  %2575 = vrot.lane.b32.xlu1 %v2554_v44, %s2734_s24 }
 0x68f   : > { %2560 = vrot.lane.b32.xlu0 %v2559_v51, %s2730_s20  ;;  %2585 = vrot.lane.b32.xlu1 %v2544_v34, %s2733_s23 }
 0x693   : > { %2570 = vrot.lane.b32.xlu0 %v2549_v50, %s2732_s22  ;;  %2595 = vrot.lane.b32.xlu1 %v2594_v52, %s2731_s21 }
 0x697   : > { %2580 = vrot.lane.b32.xlu0 %v2559_v51, %s2734_s24  ;;  %2600 = vrot.lane.b32.xlu1 %v2519_v17, %s2736_s26 }
 0x69b   : > { %2590 = vrot.lane.b32.xlu0 %v2549_v50, %s2733_s23  ;;  %2605 = vrot.lane.b32.xlu1 %v2554_v44, %s2736_s26 }
 0x69f   : > { %2610 = vrot.lane.b32.xlu0 %v2594_v52, %s2730_s20  ;;  %2620 = vrot.lane.b32.xlu1 %v2594_v52, %s2732_s22 }
 0x6a3   : > { %2615 = vrot.lane.b32.xlu0 %v2559_v51, %s2736_s26  ;;  %2625 = vrot.lane.b32.xlu1 %v3183_v15, %s2736_s26 }
 0x6a7   : > { %2630 = vrot.lane.b32.xlu0 %v2519_v17, %s2735_s25  ;;  %2635 = vrot.lane.b32.xlu1 %v3191_v6, %s2736_s26 }
 0x6ab   : > { %2640 = vrot.lane.b32.xlu0 %v2594_v52, %s2734_s24  ;;  %2655 = vrot.lane.b32.xlu1 %v2594_v52, %s2733_s23 }
 0x6af   : > { %2645 = vrot.lane.b32.xlu0 %v2504_v24, %s2735_s25  ;;  %2660 = vrot.lane.b32.xlu1 %v2544_v34, %s2735_s25 }
 0x6b3   : > { %2650 = vrot.lane.b32.xlu0 %v3183_v15, %s2735_s25  ;;  %2675 = vrot.lane.b32.xlu1 %v2519_v17, %s2739_s27 }
 0x6b7   : > { %2665 = vrot.lane.b32.xlu0 %v2594_v52, %s2736_s26  ;;  %2680 = vrot.lane.b32.xlu1 %v2594_v52, %s2735_s25  ;;  %s2280_s26 = smul.u32 3, %s3554_s16 }
 0x6b9   : > { %s359_s13 = scalar_lea.vmem %s3552_s10, %s2280_s26 }
 0x6bb   : > { %2670 = vrot.lane.b32.xlu0 %v2549_v50, %s2735_s25  ;;  %2685 = vrot.lane.b32.xlu1 %v2554_v44, %s2739_s27 }
 0x6bf   : > { %2690 = vrot.lane.b32.xlu0 %v2559_v51, %s2739_s27  ;;  %2695 = vrot.lane.b32.xlu1 %v2694_v53, %s2739_s27 }
 0x6c3   : > { %2700 = vrot.lane.b32.xlu0 %v2594_v52, %s2739_s27  ;;  %1810 = vrot.lane.b32.xlu1 %v2943_v11, %s2739_s27  ;;  %v3289_v11 = vpop.permute.xlu1 %2490 }
 0x6c7   : > { %1808 = vrot.lane.b32.xlu0 %v2936_v9, %s2739_s27  ;;  %2074 = vperm.xlu1 %2468, %v2071_v10   ;;  %v3291_v57 = vpop.permute.xlu1 %2495 }
 0x6cb   : > { %1966 = vperm.xlu0 %2387, %v1963_v56   ;;  %v2478_v56 = vunpack.i.h.bf16 %v3219_v37  ;;  %v2493_v37 = vunpack.i.h.bf16 %v3289_v11 }
 0x6cf   : > { %2101 = vperm.xlu0 %2387, %v2098_v29  }
 0x6e2   : > { %v2521_v59 = vpop.permute.xlu1 %2520 }
 0x6e3   : > { %v2523_v38 = vunpack.i.h.bf16 %v2521_v59  ;;  %v2522_v62 = vunpack.i.l.bf16 %v2521_v59  ;;  %v3343_v59 = vsel %vm423_vm2, %v2477_v46, %v2478_v56 }
 0x6e5   : > { %v1456_v9 = vsel %vm405_vm1, %v2522_v62, %v2523_v38 }
 0x6e6   : > { %v1924_v60 = vpack.c.bf16 %v1456_v9, %v2933_v7  ;;  %v3299_v20 = vpop.permute.xlu1 %2525 }
 0x6e7   : > { %v2528_v9 = vunpack.i.h.bf16 %v3299_v20 }
 0x6e8   : > { %1989 = vmatprep.subr.bf16.mxu0 %v1924_v60  ;;  %v2527_v60 = vunpack.i.l.bf16 %v3299_v20 }
 0x6e9   : > { %v2506_v0 = vpop.permute.xlu0 %2505 }
 0x6ea   : > { %v2508_v2 = vunpack.i.h.bf16 %v2506_v0  ;;  %v2507_v3 = vunpack.i.l.bf16 %v2506_v0  ;;  %v3305_v13 = vpop.permute.xlu1 %2535  ;;  %v2483_v0 = vunpack.i.h.bf16 %v3224_v45 }
 0x6ec   : > { %v1457_v22 = vsel %vm405_vm1, %v2523_v38, %v2508_v2  ;;  %v1455_v30 = vsel %vm405_vm1, %v2507_v3, %v2522_v62  ;;  %v2488_v38 = vunpack.i.h.bf16 %v3293_v58  ;;  %v2487_v62 = vunpack.i.l.bf16 %v3293_v58 }
 0x6ed   : > { %v1925_v5 = vpack.c.bf16 %v1457_v22, %v2719_v33  ;;  %v1923_v31 = vpack.c.bf16 %v1455_v30, %v2720_v1  ;;  %v3303_v48 = vpop.permute.xlu0 %2510  ;;  %v2503_v2 = vunpack.i.h.bf16 %v3295_v14  ;;  %v2502_v3 = vunpack.i.l.bf16 %v3295_v14 }
 0x6ef   : > { %2031 = vmatpush1.bf16.msra.mxu1 %v1925_v5  ;;  %1990 = vmatpush1.bf16.msra.mxu0 %v1923_v31 }
 0x6f0   : > { %2032 = vmatprep.subr.bf16.mxu1 %v2737_v8 }
 0x6f1   : > { %v3308_v7 = vpop.permute.xlu0 %2515  ;;  %v2546_v15 = vpop.permute.xlu1 %2545 }
 0x6f2   : > { %v2548_v24 = vunpack.i.h.bf16 %v2546_v15  ;;  %v2547_v27 = vunpack.i.l.bf16 %v2546_v15 }
 0x6f4   : > { %v1461_v63 = vsel %vm405_vm1, %v2548_v24, %v2472_v23  ;;  %v2538_v23 = vunpack.i.h.bf16 %v3305_v13  ;;  %v1507_v24 = vsel %vm423_vm2, %v2527_v60, %v2528_v9 }
 0x6f5   : > { %v3310_v6 = vpop.permute.xlu0 %2530  ;;  %v3312_v4 = vpop.permute.xlu1 %2555 }
 0x6f6   : > { %v2533_v46 = vunpack.i.h.bf16 %v3310_v6  ;;  %v2532_v30 = vunpack.i.l.bf16 %v3310_v6  ;;  %v2557_v33 = vunpack.i.l.bf16 %v3312_v4  ;;  %v2558_v31 = vunpack.i.h.bf16 %v3312_v4 }
 0x6f9   : > { %v3314_v36 = vpop.permute.xlu0 %2540  ;;  %v3316_v39 = vpop.permute.xlu1 %2565 }
 0x6fd   : > { %v2551_v54 = vpop.permute.xlu0 %2550  ;;  %v3318_v16 = vpop.permute.xlu1 %2575 }
 0x6fe   : > { %v2553_v25 = vunpack.i.h.bf16 %v2551_v54  ;;  %v2552_v28 = vunpack.i.l.bf16 %v2551_v54  ;;  %v2492_v54 = vunpack.i.l.bf16 %v3289_v11 }
 0x700   : > { %v1463_v44 = vsel %vm405_vm1, %v2473_v19, %v2553_v25  ;;  %v2513_v19 = vunpack.i.h.bf16 %v3303_v48  ;;  %v2537_v25 = vunpack.i.l.bf16 %v3305_v13 }
 0x701   : > { %v2561_v17 = vpop.permute.xlu0 %2560  ;;  %v3320_v18 = vpop.permute.xlu1 %2585 }
 0x702   : > { %v2562_v22 = vunpack.i.l.bf16 %v2561_v17  ;;  %v2563_v20 = vunpack.i.h.bf16 %v2561_v17  ;;  %v1559_v4 = vsel %vm441_vm3, %v2533_v46, %v2513_v19  ;;  %v1506_v17 = vsel %vm423_vm2, %v2557_v33, %v2527_v60 }
 0x703   : > { %v2567_v19 = vunpack.i.l.bf16 %v3316_v39  ;;  %v2588_v58 = vunpack.i.h.bf16 %v3320_v18 }
 0x704   : > { %v1508_v6 = vsel %vm423_vm2, %v2528_v9, %v2562_v22 }
 0x705   : > { %v3322_v26 = vpop.permute.xlu0 %2570  ;;  %v2596_v21 = vpop.permute.xlu1 %2595 }
 0x706   : > { %v2598_v34 = vunpack.i.h.bf16 %v2596_v21  ;;  %v2597_v35 = vunpack.i.l.bf16 %v2596_v21  ;;  %v2573_v9 = vunpack.i.h.bf16 %v3322_v26  ;;  %v2572_v60 = vunpack.i.l.bf16 %v3322_v26 }
 0x708   : > { %v1460_v47 = vsel %vm405_vm1, %v2598_v34, %v2552_v28  ;;  %v1458_v12 = vsel %vm405_vm1, %v2547_v27, %v2597_v35  ;;  %v1459_v50 = vsel %vm405_vm1, %v2597_v35, %v2598_v34  ;;  %v1558_v35 = vsel %vm441_vm3, %v2532_v30, %v2533_v46 }
 0x709   : > { %v3330_v51 = vpop.permute.xlu0 %2580  ;;  %v1928_v52 = vpack.c.bf16 %v1463_v44, %v1460_v47  ;;  %v1926_v53 = vpack.c.bf16 %v1461_v63, %v1458_v12  ;;  %v3332_v61 = vpop.permute.xlu1 %2600  ;;  %v1927_v10 = vpack.c.bf16 %v1462_v43, %v1459_v50  ;;  %v1514_v50 = vsel %vm423_vm2, %v2478_v56, %v2483_v0 }
 0x70a   : > { %v3395_v56 = vsel %vm477_vm5, %v2502_v3, %v2503_v2  ;;  %v2498_v0 = vunpack.i.h.bf16 %v3291_v57  ;;  %v1934_v22 = vpack.c.bf16 %v1559_v4, %v1514_v50  ;;  %v1933_v33 = vpack.c.bf16 %v1558_v35, %v3343_v59 }
 0x70b   : > { %1991 = vmatprep.subr.bf16.mxu0 %v1927_v10  ;;  %2033 = vmatpush1.bf16.msra.mxu1 %v1928_v52  ;;  %v2512_v52 = vunpack.i.l.bf16 %v3303_v48  ;;  %v1564_v10 = vsel %vm441_vm3, %v2487_v62, %v2488_v38  ;;  %v3388_v48 = vsel %vm459_vm4, %v2492_v54, %v2493_v37  ;;  %v2568_v59 = vunpack.i.h.bf16 %v3316_v39 }
 0x70c   : > { %1992 = vmatpush1.bf16.msra.mxu0 %v1926_v53  ;;  %2034 = vmatprep.subr.bf16.mxu1 %v2737_v8  ;;  %vm2158_vm1 = vcmp.lt.s32.totalorder %v689_v40, 384 }
 0x70d   : > { %v3336_v29 = vpop.permute.xlu0 %2590  ;;  %v3338_v32 = vpop.permute.xlu1 %2605  ;;  %v1557_v26 = vsel %vm441_vm3, %v2512_v52, %v2532_v30  ;;  %v1609_v30 = vsel %vm459_vm4, %v2537_v25, %v2538_v23 }
 0x711   : > { %v2611_v5 = vpop.permute.xlu0 %2610  ;;  %v2621_v1 = vpop.permute.xlu1 %2620 }
 0x712   : > { %v2613_v15 = vunpack.i.h.bf16 %v2611_v5  ;;  %v2612_v45 = vunpack.i.l.bf16 %v2611_v5  ;;  %v2623_v44 = vunpack.i.h.bf16 %v2621_v1  ;;  %v2622_v47 = vunpack.i.l.bf16 %v2621_v1 }
 0x713   : > { %v2518_v1 = vunpack.i.h.bf16 %v3308_v7 }
 0x714   : > { %v1511_v21 = vsel %vm423_vm2, %v2613_v15, %v2563_v20  ;;  %v1509_v27 = vsel %vm423_vm2, %v2558_v31, %v2612_v45  ;;  %v1510_v12 = vsel %vm423_vm2, %v2612_v45, %v2613_v15  ;;  %v1562_v31 = vsel %vm441_vm3, %v2623_v44, %v2572_v60 }
 0x715   : > { %v1931_v28 = vpack.c.bf16 %v1511_v21, %v1508_v6  ;;  %v3367_v34 = vpop.permute.xlu0 %2615  ;;  %v3370_v63 = vpop.permute.xlu1 %2625  ;;  %v1929_v43 = vpack.c.bf16 %v1509_v27, %v1506_v17  ;;  %v1930_v53 = vpack.c.bf16 %v1510_v12, %v1507_v24  ;;  %v1561_v20 = vsel %vm441_vm3, %v2622_v47, %v2623_v44 }
 0x716   : > { %v2543_v15 = vunpack.i.h.bf16 %v3314_v36  ;;  %v2542_v45 = vunpack.i.l.bf16 %v3314_v36  ;;  %v2517_v24 = vunpack.i.l.bf16 %v3308_v7  ;;  %v1932_v6 = vpack.c.bf16 %v1557_v26, %v3231_v49 }
 0x717   : > { %2035 = vmatpush1.bf16.msra.mxu1 %v1931_v28  ;;  %1993 = vmatprep.subr.bf16.mxu0 %v1930_v53  ;;  %v1565_v21 = vsel %vm441_vm3, %v2488_v38, %v2573_v9  ;;  %v2582_v27 = vunpack.i.l.bf16 %v3330_v51  ;;  %v2577_v36 = vunpack.i.l.bf16 %v3318_v16  ;;  %v1560_v17 = vsel %vm441_vm3, %v2567_v19, %v2622_v47 }
 0x718   : > { %2036 = vmatprep.subr.bf16.mxu1 %v2737_v8  ;;  %1994 = vmatpush1.bf16.msra.mxu0 %v1929_v43  ;;  %v1937_v4 = vpack.c.bf16 %v1565_v21, %v1562_v31  ;;  %v1936_v28 = vpack.c.bf16 %v1564_v10, %v1561_v20  ;;  %v2578_v7 = vunpack.i.h.bf16 %v3318_v16  ;;  %v2583_v49 = vunpack.i.h.bf16 %v3330_v51 }
 0x719   : > { %v3399_v46 = vpop.permute.xlu0 %2630  ;;  %v3402_v5 = vpop.permute.xlu1 %2635  ;;  %1995 = vmatprep.subr.bf16.mxu0 %v1933_v33  ;;  %v2497_v38 = vunpack.i.l.bf16 %v3291_v57  ;;  %v1661_v12 = vsel %vm477_vm5, %v2543_v15, %v2518_v1  ;;  %v1659_v50 = vsel %vm477_vm5, %v2517_v24, %v2542_v45  ;;  %v1563_v47 = vsel %vm441_vm3, %v2568_v59, %v2487_v62 }
 0x71a   : > { %v1610_v16 = vsel %vm459_vm4, %v2538_v23, %v2582_v27  ;;  %v1935_v51 = vpack.c.bf16 %v1563_v47, %v1560_v17  ;;  %v1608_v57 = vsel %vm459_vm4, %v2577_v36, %v2537_v25  ;;  %v1660_v9 = vsel %vm477_vm5, %v2542_v45, %v2543_v15 }
 0x71b   : > { %2037 = vmatpush1.bf16.msra.mxu1 %v1934_v22  ;;  %v1614_v13 = vsel %vm459_vm4, %v2497_v38, %v2492_v54  ;;  %v2603_v25 = vunpack.i.h.bf16 %v3332_v61  ;;  %v2602_v1 = vunpack.i.l.bf16 %v3332_v61  ;;  %v1616_v20 = vsel %vm459_vm4, %v2493_v37, %v2498_v0 }
 0x71c   : > { %2038 = vmatprep.subr.bf16.mxu1 %v2737_v8  ;;  %1996 = vmatpush1.bf16.msra.mxu0 %v1932_v6  ;;  %v2593_v15 = vunpack.i.h.bf16 %v3336_v29  ;;  %v2592_v45 = vunpack.i.l.bf16 %v3336_v29  ;;  %v2607_v59 = vunpack.i.l.bf16 %v3338_v32  ;;  %v1941_v19 = vpack.c.bf16 %v1659_v50, %v1614_v13 }
 0x71d   : > { %v2641_v39 = vpop.permute.xlu0 %2640  ;;  %v2656_v35 = vpop.permute.xlu1 %2655  ;;  %1997 = vmatprep.subr.bf16.mxu0 %v1936_v28  ;;  %v1943_v54 = vpack.c.bf16 %v1661_v12, %v1616_v20  ;;  %v2587_v24 = vunpack.i.l.bf16 %v3320_v18  ;;  %v1665_v37 = vsel %vm477_vm5, %v2588_v58, %v2502_v3  ;;  %v2617_v29 = vunpack.i.l.bf16 %v3367_v34 }
 0x71e   : > { %v2643_v43 = vunpack.i.h.bf16 %v2641_v39  ;;  %v2642_v44 = vunpack.i.l.bf16 %v2641_v39  ;;  %v2658_v26 = vunpack.i.h.bf16 %v2656_v35  ;;  %v2657_v22 = vunpack.i.l.bf16 %v2656_v35 }
 0x71f   : > { %2039 = vmatpush1.bf16.msra.mxu1 %v1937_v4  ;;  %v2608_v18 = vunpack.i.h.bf16 %v3338_v32  ;;  %v2633_v21 = vunpack.i.h.bf16 %v3399_v46  ;;  %v2632_v27 = vunpack.i.l.bf16 %v3399_v46  ;;  %v1667_v3 = vsel %vm477_vm5, %v2503_v2, %v2593_v15 }
 0x720   : > { %v1613_v52 = vsel %vm459_vm4, %v2643_v43, %v2583_v49  ;;  %v1611_v53 = vsel %vm459_vm4, %v2578_v7, %v2642_v44  ;;  %2040 = vmatprep.subr.bf16.mxu1 %v2737_v8  ;;  %1998 = vmatpush1.bf16.msra.mxu0 %v1935_v51  ;;  %v1612_v33 = vsel %vm459_vm4, %v2642_v44, %v2643_v43  ;;  %v2618_v4 = vunpack.i.h.bf16 %v3367_v34 }
 0x721   : > { %v1940_v62 = vpack.c.bf16 %v1613_v52, %v1610_v16  ;;  %v3443_v10 = vpop.permute.xlu0 %2645  ;;  %v3446_v60 = vpop.permute.xlu1 %2660  ;;  %v1938_v23 = vpack.c.bf16 %v1611_v53, %v1608_v57  ;;  %v1939_v31 = vpack.c.bf16 %v1612_v33, %v1609_v30  ;;  %v1942_v30 = vpack.c.bf16 %v1660_v9, %v3388_v48 }
 0x722   : > { %v1664_v0 = vsel %vm477_vm5, %v2658_v26, %v2592_v45  ;;  %v1663_v6 = vsel %vm477_vm5, %v2657_v22, %v2658_v26  ;;  %v1711_v48 = vsel %vm495_vm6, %v2602_v1, %v2603_v25  ;;  %v1710_v36 = vsel %vm495_vm6, %v2607_v59, %v2602_v1 }
 0x723   : > { %2041 = vmatpush1.bf16.msra.mxu1 %v1940_v62  ;;  %1999 = vmatprep.subr.bf16.mxu0 %v1939_v31  ;;  %v1662_v17 = vsel %vm477_vm5, %v2587_v24, %v2657_v22  ;;  %v2628_v32 = vunpack.i.h.bf16 %v3370_v63  ;;  %v2648_v46 = vunpack.i.h.bf16 %v3443_v10  ;;  %v1946_v39 = vpack.c.bf16 %v1667_v3, %v1664_v0 }
 0x724   : > { %2042 = vmatprep.subr.bf16.mxu1 %v2737_v8  ;;  %2000 = vmatpush1.bf16.msra.mxu0 %v1938_v23  ;;  %v1945_v35 = vpack.c.bf16 %v3395_v56, %v1663_v6  ;;  %v1712_v14 = vsel %vm495_vm6, %v2603_v25, %v2617_v29  ;;  %v2627_v2 = vunpack.i.l.bf16 %v3370_v63  ;;  %v2638_v43 = vunpack.i.h.bf16 %v3402_v5 }
 0x725   : > { %v3462_v61 = vpop.permute.xlu0 %2650  ;;  %v3465_v11 = vpop.permute.xlu1 %2675  ;;  %2001 = vmatprep.subr.bf16.mxu0 %v1942_v30  ;;  %v2637_v44 = vunpack.i.l.bf16 %v3402_v5  ;;  %v1944_v38 = vpack.c.bf16 %v1665_v37, %v1662_v17  ;;  %v1762_v12 = vsel %vm513_vm7, %v2632_v27, %v2633_v21  ;;  %v2647_v50 = vunpack.i.l.bf16 %v3443_v10 }
 0x726   : > { %v1763_v16 = vsel %vm513_vm7, %v2633_v21, %v2648_v46  ;;  %v2652_v23 = vunpack.i.l.bf16 %v3462_v61  ;;  %v1718_v26 = vsel %vm495_vm6, %v2628_v32, %v2638_v43  ;;  %v2653_v33 = vunpack.i.h.bf16 %v3462_v61 }
 0x727   : > { %2043 = vmatpush1.bf16.msra.mxu1 %v1943_v54  ;;  %v1761_v22 = vsel %vm513_vm7, %v2647_v50, %v2632_v27  ;;  %v1717_v13 = vsel %vm495_vm6, %v2627_v2, %v2628_v32  ;;  %v1716_v25 = vsel %vm495_vm6, %v2637_v44, %v2627_v2  ;;  %v1952_v1 = vpack.c.bf16 %v1763_v16, %v1718_v26 }
 0x728   : > { %2044 = vmatprep.subr.bf16.mxu1 %v2737_v8  ;;  %2002 = vmatpush1.bf16.msra.mxu0 %v1941_v19  ;;  %v2663_v31 = vunpack.i.h.bf16 %v3446_v60  ;;  %v1951_v15 = vpack.c.bf16 %v1762_v12, %v1717_v13  ;;  %v2662_v45 = vunpack.i.l.bf16 %v3446_v60  ;;  %v1950_v24 = vpack.c.bf16 %v1761_v22, %v1716_v25 }
 0x729   : > { %v2666_v28 = vpop.permute.xlu0 %2665  ;;  %v2681_v7 = vpop.permute.xlu1 %2680  ;;  %2003 = vmatprep.subr.bf16.mxu0 %v1945_v35  ;;  %v2678_v30 = vunpack.i.h.bf16 %v3465_v11  ;;  %v2677_v37 = vunpack.i.l.bf16 %v3465_v11 }
 0x72a   : > { %v2668_v49 = vunpack.i.h.bf16 %v2666_v28  ;;  %v2667_v34 = vunpack.i.l.bf16 %v2666_v28  ;;  %v2683_v5 = vunpack.i.h.bf16 %v2681_v7  ;;  %v2682_v10 = vunpack.i.l.bf16 %v2681_v7 }
 0x72b   : > { %2045 = vmatpush1.bf16.msra.mxu1 %v1946_v39  ;;  %v1767_v61 = vsel %vm513_vm7, %v2663_v31, %v2652_v23  ;;  %v1813_v39 = vsel %vm531_vm8, %v2677_v37, %v2678_v30 }
 0x72c   : > { %v1713_v56 = vsel %vm495_vm6, %v2608_v18, %v2667_v34  ;;  %v1715_v47 = vsel %vm495_vm6, %v2668_v49, %v2618_v4  ;;  %2046 = vmatprep.subr.bf16.mxu1 %v2737_v8  ;;  %v1714_v63 = vsel %vm495_vm6, %v2667_v34, %v2668_v49  ;;  %2004 = vmatpush1.bf16.msra.mxu0 %v1944_v38 }
 0x72d   : > { %v1949_v51 = vpack.c.bf16 %v1715_v47, %v1712_v14  ;;  %v2671_v52 = vpop.permute.xlu0 %2670  ;;  %v1948_v53 = vpack.c.bf16 %v1714_v63, %v1711_v48  ;;  %v2686_v57 = vpop.permute.xlu1 %2685  ;;  %v1947_v58 = vpack.c.bf16 %v1713_v56, %v1710_v36  ;;  %v1765_v54 = vsel %vm513_vm7, %v2682_v10, %v2683_v5 }
 0x72e   : > { %v2673_v62 = vunpack.i.h.bf16 %v2671_v52  ;;  %v2672_v9 = vunpack.i.l.bf16 %v2671_v52  ;;  %v1764_v0 = vsel %vm513_vm7, %v2662_v45, %v2682_v10  ;;  %v2688_v6 = vunpack.i.h.bf16 %v2686_v57 }
 0x72f   : > { %2005 = vmatprep.subr.bf16.mxu0 %v1948_v53  ;;  %2047 = vmatpush1.bf16.msra.mxu1 %v1949_v51  ;;  %v1768_v18 = vsel %vm513_vm7, %v2652_v23, %v2653_v33  ;;  %v2687_v48 = vunpack.i.l.bf16 %v2686_v57  ;;  %v1953_v46 = vpack.c.bf16 %v1767_v61, %v1764_v0  ;;  %v2232_v52 = vcombine.low %v3272_v55, %v3272_v55 }
 0x730   : > { %2048 = vmatprep.subr.bf16.mxu1 %v2737_v8  ;;  %v1769_v59 = vsel %vm513_vm7, %v2653_v33, %v2673_v62  ;;  %v1766_v19 = vsel %vm513_vm7, %v2683_v5, %v2672_v9  ;;  %2006 = vmatpush1.bf16.msra.mxu0 %v1947_v58  ;;  %v1954_v36 = vpack.c.bf16 %v1768_v18, %v1765_v54 }
 0x731   : > { %v2691_v20 = vpop.permute.xlu0 %2690  ;;  %2007 = vmatprep.subr.bf16.mxu0 %v1951_v15  ;;  %v2696_v29 = vpop.permute.xlu1 %2695  ;;  %v1955_v21 = vpack.c.bf16 %v1769_v59, %v1766_v19  ;;  %v1812_v2 = vsel %vm531_vm8, %v2687_v48, %v2677_v37 }
 0x732   : > { %v2692_v60 = vunpack.i.l.bf16 %v2691_v20  ;;  %v2693_v27 = vunpack.i.h.bf16 %v2691_v20  ;;  %v2698_v11 = vunpack.i.h.bf16 %v2696_v29  ;;  %v2697_v32 = vunpack.i.l.bf16 %v2696_v29 }
 0x733   : > { %2049 = vmatpush1.bf16.msra.mxu1 %v1952_v1 }
 0x734   : > { %2050 = vmatprep.subr.bf16.mxu1 %v2737_v8  ;;  %2008 = vmatpush1.bf16.msra.mxu0 %v1950_v24  ;;  %v1814_v28 = vsel %vm531_vm8, %v2678_v30, %v2692_v60  ;;  %v1818_v56 = vsel %vm531_vm8, %v2697_v32, %v2698_v11 }
 0x735   : > { %v2701_v3 = vpop.permute.xlu0 %2700  ;;  %2009 = vmatprep.subr.bf16.mxu0 %v1954_v36  ;;  %v1811_v43 = vpop.permute.xlu1 %1810  ;;  %v1959_v51 = vpack.c.bf16 %v1818_v56, %v1818_v56 }
 0x736   : > { %v2703_v4 = vunpack.i.h.bf16 %v2701_v3  ;;  %v2702_v17 = vunpack.i.l.bf16 %v2701_v3 }
 0x737   : > { %2051 = vmatpush1.bf16.msra.mxu1 %v1955_v21  ;;  %v1979_v5 = vsel %vm594_vm9, %v1959_v51, 0 }
 0x738   : > { %v1815_v35 = vsel %vm531_vm8, %v2688_v6, %v2702_v17  ;;  %v1817_v7 = vsel %vm531_vm8, %v2703_v4, %v2693_v27  ;;  %2052 = vmatprep.subr.bf16.mxu1 %v2737_v8  ;;  %v1816_v14 = vsel %vm531_vm8, %v2702_v17, %v2703_v4  ;;  %2010 = vmatpush1.bf16.msra.mxu0 %v1953_v46 }
 0x739   : > { %v1958_v49 = vpack.c.bf16 %v1817_v7, %v1814_v28  ;;  %v1809_v34 = vpop.permute.xlu0 %1808  ;;  %v1957_v44 = vpack.c.bf16 %v1816_v14, %v1813_v39  ;;  %v1956_v38 = vpack.c.bf16 %v1815_v35, %v1812_v2 }
 0x73a   : > { %v1819_v12 = vsel %vm531_vm8, %v2698_v11, %v1809_v34  ;;  %v1820_v50 = vsel %vm531_vm8, %v1809_v34, %v1811_v43 }
 0x73b   : > { %v1960_v47 = vpack.c.bf16 %v1819_v12, %v1819_v12  ;;  %v1961_v63 = vpack.c.bf16 %v1820_v50, %v1820_v50  ;;  %2011 = vmatprep.subr.bf16.mxu0 %v1957_v44  ;;  %2053 = vmatpush1.bf16.msra.mxu1 %v1958_v49  ;;  %v2746_v50 = vmov 1966171168  }
 0x73c   : > { %2054 = vmatprep.subr.bf16.mxu1 %v2737_v8  ;;  %2012 = vmatpush1.bf16.msra.mxu0 %v1956_v38  ;;  %v2134_v56 = vunpack.c.l.s4 %v2746_v50 }
 0x73d   : > { %v1985_v16 = vsel %vm594_vm9, %v1961_v63, 0  ;;  %2234 = vmatprep.subr.msk.bf16.mxu0 %vm594_vm9, %v1960_v47 }
 0x73e   : > { %v2135_v47 = vunpack.c.0.s8 %v2134_v56 }
 0x73f   : > { %2055 = vmatpush1.bf16.msra.mxu1 %v1985_v16 }
 0x740   : > { %2014 = vmatpush1.bf16.msra.mxu0 %v1979_v5  ;;  %v2138_v51 = vsub.s32 %v2135_v47, %v2910_v41 }
 0x742   : > { %2061 = vmatmul.mubr.bf16.vlgmr.msra.gmra.mrb[8].mxu1 %v2232_v52 }
 0x743   : > { %2020 = vmatmul.mubr.bf16.vlgmr.msra.gmra.mrb[8].mxu0 %v2232_v52 }
 0x746   : > { %v2075_v26 = vpop.permute.xlu1 %2074 }
 0x74a   : > { %v1967_v53 = vpop.permute.xlu0 %1966 }
 0x74e   : > { %v2102_v0 = vpop.permute.xlu0 %2101 }
 0x74f   : > { %v2107_v27 = vrot.slane %v2102_v0, %v2913_v42 }
 0x815   : > { %v2062_v57 = vpop.f32.mrb[8].mxu1 }
 0x816   : > { %v2063_v58 = vadd.f32 %v2062_v57, %v1967_v53  ;;  %v2064_v62 = vpop.f32.mrb[9].mxu1  ;;  %v2021_v10 = vpop.f32.mrb[8].mxu0 }
 0x817   : > { %v2065_v8 = vpop.f32.mrb[10].mxu1  ;;  %v2022_v22 = vadd.f32 %v2021_v10, %v1967_v53  ;;  %v2023_v33 = vpop.f32.mrb[9].mxu0 }
 0x818   : > { %v2070_v9 = vmax.f32 %v2063_v58, 0.0  ;;  %v2066_v23 = vpop.f32.mrb[11].mxu1  ;;  %v2024_v13 = vadd.f32 %v2023_v33, %v1967_v53  ;;  %v2025_v25 = vpop.f32.mrb[10].mxu0 }
 0x819   : > { %v2068_v1 = vmax.f32 %v2022_v22, 0.0  ;;  %v2026_v31 = vpop.f32.mrb[11].mxu0 }
 0x81a   : > { %v2079_v55 = vmul.f32 %v2075_v26, %v2070_v9  ;;  %v2069_v15 = vmax.f32 %v2024_v13, 0.0 }
 0x81b   : > { %v2077_v45 = vmul.f32 %v2075_v26, %v2068_v1 }
 0x81c   : > { %v2092_v20 = vrot.slane %v2079_v55, 4  ;;  %v2078_v19 = vmul.f32 %v2075_v26, %v2069_v15 }
 0x81d   : > { %v2080_v54 = vrot.slane %v2077_v45, 4 }
 0x81e   : > { %v2093_v59 = vadd.f32 %v2092_v20, %v2079_v55  ;;  %v2086_v61 = vrot.slane %v2078_v19, 4 }
 0x81f   : > { %v2081_v30 = vadd.f32 %v2080_v54, %v2077_v45 }
 0x820   : > { %v2094_v24 = vrot.slane %v2093_v59, 2  ;;  %v2087_v29 = vadd.f32 %v2086_v61, %v2078_v19 }
 0x821   : > { %v2082_v60 = vrot.slane %v2081_v30, 2 }
 0x822   : > { %v2095_v37 = vadd.f32 %v2094_v24, %v2093_v59  ;;  %v2088_v18 = vrot.slane %v2087_v29, 2 }
 0x823   : > { %v2083_v21 = vadd.f32 %v2082_v60, %v2081_v30 }
 0x824   : > { %v2096_v6 = vrot.slane %v2095_v37, 1  ;;  %v2089_v3 = vadd.f32 %v2088_v18, %v2087_v29 }
 0x825   : > { %v2084_v36 = vrot.slane %v2083_v21, 1 }
 0x826   : > { %v2097_v48 = vadd.f32 %v2096_v6, %v2095_v37  ;;  %v2090_v17 = vrot.slane %v2089_v3, 1 }
 0x827   : > { %v2085_v11 = vadd.f32 %v2084_v36, %v2083_v21 }
 0x828   : > { %v2110_v4 = vadd.f32 %v2107_v27, %v2097_v48  ;;  %v2091_v46 = vadd.f32 %v2090_v17, %v2089_v3 }
 0x829   : > { %v2108_v39 = vadd.f32 %v2107_v27, %v2085_v11 }
 0x82a   : > { %v2113_v32 = vsub.f32 0.0, %v2110_v4  ;;  %v2109_v35 = vadd.f32 %v2107_v27, %v2091_v46 }
 0x82b   : > { %v2111_v7 = vsub.f32 0.0, %v2108_v39 }
 0x82c   : > { %v2118_v28 = vmul.f32 1.442695, %v2113_v32  ;;  %v2112_v14 = vsub.f32 0.0, %v2109_v35 }
 0x82d   : > { %v2114_v2 = vmul.f32 1.442695, %v2111_v7 }
 0x82e   : > { %2707 = vpow2.f32 %v2118_v28  ;;  %v2116_v49 = vmul.f32 1.442695, %v2112_v14 }
 0x82f   : > { %2709 = vpow2.f32 %v2114_v2 }
 0x830   : > { %2711 = vpow2.f32 %v2116_v49 }
 0x838   : > { %v2708_v34 = vpop.eup %2707 }
 0x839   : > { %v2122_v42 = vadd.f32 1.0, %v2708_v34  ;;  %v2710_v43 = vpop.eup %2709 }
 0x83a   : > { %v2712_v44 = vpop.eup %2711  ;;  %v2120_v38 = vadd.f32 1.0, %v2710_v43 }
 0x83b   : > { %2713 = vrcp.f32 %v2122_v42  ;;  %v2121_v12 = vadd.f32 1.0, %v2712_v44 }
 0x83c   : > { %2715 = vrcp.f32 %v2120_v38 }
 0x83d   : > { %2717 = vrcp.f32 %v2121_v12 }
 0x845   : > { %v2714_v63 = vpop.eup %2713 }
 0x846   : > { %v2716_v16 = vpop.eup %2715  ;;  %v2146_v53 = vrot.slane %v2714_v63, %v2138_v51 }
 0x847   : > { %v2718_v52 = vpop.eup %2717 }
 0x848   : > { %v2132_v5 = vcombine.low %v2716_v16, %v2718_v52 }
 0x84a   : > { %v2139_v57 = vrot.slane %v2132_v5, %v2138_v51 }
 0x84c   : > { %v2147_v58 = vcombine.low %v2139_v57, %v2146_v53 }
 0x84e   : > { %v2154_v62 = vrot.slane %v2147_v58, %v2138_v51 }
 0x850   : > { %2160 = vst.msk [vmem:[%s359_s13] sm:$0x7] %vm2158_vm1, %v2154_v62 }
 0x851 PF: > { %s22_s15 = sadd.s32 1, %s2727_s15  }
 0x852   : > { %p19_p4 = scmp.ge.s32.totalorder %s22_s15, 4  }
 0x854   :  { %21 = sbr.rel (!%p19_p4) target bundleno = 3 (0x3), region = 94 }

</bundles_post_ra>
